<compile_context>
chip_gen: v7x
topology: tpu7x:2x2x1
jax: 0.10.0
libtpu: 0.0.40
codegen_flags: <defaults>
</compile_context>

<pallas_src>
import jax
import jax.numpy as jnp
from jax.experimental import pallas as pl
from jax.experimental.pallas import tpu as pltpu


# ------------------------------ fused Pallas kernel ------------------------------

def _fused_forward_kernel(x_ref, a1_ref, b1_ref, sh1_ref, sw1_ref,
                          a2_ref, b2_ref, sh2_ref, sw2_ref, wf_ref, bf_ref,
                          o_ref, p1_ref, p2_ref):
    f32 = jnp.float32

    # ---- conv1 (5x5 valid, 3->6) as 5 banded matmuls over kernel rows, + bias + ReLU ----
    # activation slab layout: rows = H, lanes = W*C_out (channel fastest)
    y = jnp.dot(x_ref[0, pl.ds(0, 28), :], a1_ref[0], preferred_element_type=f32)
    for ki in range(1, 5):
        y = y + jnp.dot(x_ref[0, pl.ds(ki, 28), :], a1_ref[ki],
                        preferred_element_type=f32)
    y = jnp.maximum(y + b1_ref[...], 0.0)                                   # (28, 168)

    # ---- maxpool 2x2 stride 2: even/odd row selection then even/odd col-block selection ----
    y = jnp.maximum(jnp.dot(sh1_ref[0], y, preferred_element_type=f32),
                    jnp.dot(sh1_ref[1], y, preferred_element_type=f32))     # (14, 168)
    y = jnp.maximum(jnp.dot(y, sw1_ref[0], preferred_element_type=f32),
                    jnp.dot(y, sw1_ref[1], preferred_element_type=f32))     # (14, 84)
    p1_ref[...] = y                                                         # VMEM resident

    # ---- conv2 (5x5 valid, 6->16), same banded-matmul scheme ----
    z = jnp.dot(p1_ref[pl.ds(0, 10), :], a2_ref[0], preferred_element_type=f32)
    for ki in range(1, 5):
        z = z + jnp.dot(p1_ref[pl.ds(ki, 10), :], a2_ref[ki],
                        preferred_element_type=f32)
    z = jnp.maximum(z + b2_ref[...], 0.0)                                   # (10, 160)

    z = jnp.maximum(jnp.dot(sh2_ref[0], z, preferred_element_type=f32),
                    jnp.dot(sh2_ref[1], z, preferred_element_type=f32))     # (5, 160)
    z = jnp.maximum(jnp.dot(z, sw2_ref[0], preferred_element_type=f32),
                    jnp.dot(z, sw2_ref[1], preferred_element_type=f32))     # (5, 80)
    p2_ref[...] = z

    # ---- fc1: per-row matmuls against weights pre-permuted to torch's (C,H,W) flatten ----
    out = jnp.dot(p2_ref[pl.ds(0, 1), :], wf_ref[0], preferred_element_type=f32)
    for h in range(1, 5):
        out = out + jnp.dot(p2_ref[pl.ds(h, 1), :], wf_ref[h],
                            preferred_element_type=f32)
    o_ref[0] = out + bf_ref[...]                                            # (1,128) lane-dense


# ------------------------------ weight packing (XLA, tiny) ------------------------------

def _banded(w, w_in, w_out):
    """Conv weights (O,C,5,5) -> (5, w_in*C, w_out*O) banded matrices, one per kernel row.

    A[kh, win*C + c, wout*O + o] = w[o, c, kh, win - wout]  if 0 <= win - wout < 5 else 0,
    so that conv_out[h, w*O+o] = sum_kh  x_slab[h+kh, :] @ A[kh].
    """
    f32 = jnp.float32
    O, C, K, _ = w.shape
    shift = (jnp.arange(w_in)[None, None, :] ==
             (jnp.arange(w_out)[None, :, None] + jnp.arange(K)[:, None, None]))
    shift = shift.astype(f32)                              # (K, w_out, w_in): [kw, wout, win]
    a = jnp.einsum("kwv,ocik->ivcwo", shift, w.astype(f32))  # (K, w_in, C, w_out, O)
    return a.reshape(K, w_in * C, w_out * O)


def _pool_row_sel(n_out, n_in):
    # (2, n_out, n_in): S[p, i, r] = 1 iff r == 2*i + p   (even/odd row selection)
    r = jnp.arange(n_in)[None, None, :]
    i = jnp.arange(n_out)[None, :, None]
    p = jnp.arange(2)[:, None, None]
    return (r == 2 * i + p).astype(jnp.float32)


def _pool_col_sel(n_out, n_in, blk):
    # (2, n_in*blk, n_out*blk): S[p, w*blk+c, j*blk+c] = 1 iff w == 2*j + p
    base = jnp.transpose(_pool_row_sel(n_out, n_in), (0, 2, 1))   # [p, w, j]
    eye = jnp.eye(blk, dtype=jnp.float32)
    return jnp.stack([jnp.kron(base[0], eye), jnp.kron(base[1], eye)], axis=0)


def _pack_params(params):
    f32 = jnp.float32
    w1 = params["conv1_w"].astype(f32)     # (6, 3, 5, 5)
    b1 = params["conv1_b"].astype(f32)     # (6,)
    w2 = params["conv2_w"].astype(f32)     # (16, 6, 5, 5)
    b2 = params["conv2_b"].astype(f32)     # (16,)
    wf = params["fc1_w"].astype(f32)       # (2, 400)
    bf = params["fc1_b"].astype(f32)       # (2,)

    a1 = _banded(w1, 32, 28)               # (5, 96, 168)
    a2 = _banded(w2, 14, 10)               # (5, 84, 160)

    sh1 = _pool_row_sel(14, 28)            # (2, 14, 28)
    sw1 = _pool_col_sel(14, 28, 6)         # (2, 168, 84)
    sh2 = _pool_row_sel(5, 10)             # (2, 5, 10)
    sw2 = _pool_col_sel(5, 10, 16)         # (2, 160, 80)

    # fc1: Wf[h, w*16+c, o] = fc1_w[o, c*25 + h*5 + w]; output padded 2 -> 128 lanes.
    wf_h = jnp.transpose(wf.reshape(2, 16, 5, 5), (2, 3, 1, 0)).reshape(5, 80, 2)
    wf_h = jnp.pad(wf_h, ((0, 0), (0, 0), (0, 126)))

    bias1 = jnp.tile(b1, 28).reshape(1, 168)
    bias2 = jnp.tile(b2, 10).reshape(1, 160)
    biasf = jnp.pad(bf, (0, 126)).reshape(1, 128)

    return a1, bias1, sh1, sw1, a2, bias2, sh2, sw2, wf_h, biasf


# ------------------------------ forward wrapper ------------------------------

def neuralnet_forward(x, params):
    """Equivalent of NeuralNet.forward: x is (N, 3*32*32), returns (N, 2)."""
    N = x.shape[0]
    # torch view(-1,3,32,32) -> NHWC -> per-sample 2D slab (rows=H, lanes=W*C)
    x2d = x.reshape(N, 3, 32, 32).transpose(0, 2, 3, 1).reshape(N, 32, 96)
    a1, b1, sh1, sw1, a2, b2, sh2, sw2, wfh, bf = _pack_params(params)

    out = pl.pallas_call(
        _fused_forward_kernel,
        out_shape=jax.ShapeDtypeStruct((N, 1, 128), jnp.float32),
        grid_spec=pltpu.PrefetchScalarGridSpec(
            num_scalar_prefetch=0,
            grid=(N,),
            in_specs=[
                pl.BlockSpec((1, 32, 96), lambda i: (i, 0, 0)),     # per-sample input tile
                pl.BlockSpec((5, 96, 168), lambda i: (0, 0, 0)),    # conv1 banded weights
                pl.BlockSpec((1, 168), lambda i: (0, 0)),           # conv1 bias (tiled over W)
                pl.BlockSpec((2, 14, 28), lambda i: (0, 0, 0)),     # pool1 row selectors
                pl.BlockSpec((2, 168, 84), lambda i: (0, 0, 0)),    # pool1 col selectors
                pl.BlockSpec((5, 84, 160), lambda i: (0, 0, 0)),    # conv2 banded weights
                pl.BlockSpec((1, 160), lambda i: (0, 0)),           # conv2 bias
                pl.BlockSpec((2, 5, 10), lambda i: (0, 0, 0)),      # pool2 row selectors
                pl.BlockSpec((2, 160, 80), lambda i: (0, 0, 0)),    # pool2 col selectors
                pl.BlockSpec((5, 80, 128), lambda i: (0, 0, 0)),    # fc1 weights (O padded 128)
                pl.BlockSpec((1, 128), lambda i: (0, 0)),           # fc1 bias (padded)
            ],
            out_specs=pl.BlockSpec((1, 1, 128), lambda i: (i, 0, 0)),
            scratch_shapes=[
                pltpu.VMEM((14, 84), jnp.float32),                  # pooled conv1 activations
                pltpu.VMEM((5, 80), jnp.float32),                   # pooled conv2 activations
            ],
        ),
        compiler_params=pltpu.CompilerParams(
            dimension_semantics=("parallel",),
        ),
    )(x2d, a1, b1, sh1, sw1, a2, b2, sh2, sw2, wfh, bf)
    return out.reshape(N, 128)[:, :2]


# ------------------------------ pure-JAX reference & params ------------------------------

def _reference_forward(x, params):
    N = x.shape[0]
    xi = jnp.transpose(x.reshape(N, 3, 32, 32), (0, 2, 3, 1))       # NHWC

    def conv(inp, w, b):
        O, C, K, _ = w.shape
        Ho, Wo = inp.shape[1] - K + 1, inp.shape[2] - K + 1
        out = jnp.zeros((inp.shape[0], Ho, Wo, O), jnp.float32)
        for ki in range(K):
            for kj in range(K):
                out = out + jnp.einsum("nhwc,oc->nhwo",
                                       inp[:, ki:ki + Ho, kj:kj + Wo, :], w[:, :, ki, kj])
        return out + b

    def pool(a):
        return jnp.maximum(jnp.maximum(a[:, 0::2, 0::2, :], a[:, 0::2, 1::2, :]),
                           jnp.maximum(a[:, 1::2, 0::2, :], a[:, 1::2, 1::2, :]))

    h1 = pool(jax.nn.relu(conv(xi, params["conv1_w"], params["conv1_b"])))
    h2 = pool(jax.nn.relu(conv(h1, params["conv2_w"], params["conv2_b"])))
    flat = jnp.transpose(h2, (0, 3, 1, 2)).reshape(N, 400)           # torch (C,H,W) flatten
    return flat @ params["fc1_w"].T + params["fc1_b"]


def init_params(key):
    """Deterministic synthetic params matching the module's shapes (PyTorch-style U(+-1/sqrt(fan_in)))."""
    ks = jax.random.split(key, 6)

    def unif(k, shape, fan_in):
        bound = 1.0 / jnp.sqrt(float(fan_in))
        return jax.random.uniform(k, shape, jnp.float32, -bound, bound)

    return {
        "conv1_w": unif(ks[0], (6, 3, 5, 5), 3 * 5 * 5),
        "conv1_b": unif(ks[1], (6,), 3 * 5 * 5),
        "conv2_w": unif(ks[2], (16, 6, 5, 5), 6 * 5 * 5),
        "conv2_b": unif(ks[3], (16,), 6 * 5 * 5),
        "fc1_w":   unif(ks[4], (2, 16 * 5 * 5), 16 * 5 * 5),
        "fc1_b":   unif(ks[5], (2,), 16 * 5 * 5),
    }


if __name__ == "__main__":
    key = jax.random.PRNGKey(0)
    kx, kp = jax.random.split(key)
    params = init_params(kp)

    # (N, in_size) with in_size = 3*32*32 = 3072, as implied by forward()'s view(-1,3,32,32)
    x = jax.random.normal(kx, (2, 3 * 32 * 32), dtype=jnp.float32)

    y = jax.jit(neuralnet_forward)(x, params)
    jax.block_until_ready(y)
    assert y.shape == (2, 2) and y.dtype == jnp.float32

    ref = _reference_forward(x, params)
    rel = float(jnp.linalg.norm(y - ref) / jnp.maximum(jnp.linalg.norm(ref), 1e-6))
    assert rel < 5e-2, f"mismatch vs reference: rel_l2={rel}"
    print("KERNEL_OK")
</pallas_src>

<mosaic_0001>
module attributes {stable_mosaic.version = 11 : i64} {
  func.func @_fused_forward_kernel(%arg0: i32, %arg1: memref<1x32x96xf32, #tpu.memory_space<vmem>>, %arg2: memref<5x96x168xf32, #tpu.memory_space<vmem>>, %arg3: memref<1x168xf32, #tpu.memory_space<vmem>>, %arg4: memref<2x14x28xf32, #tpu.memory_space<vmem>>, %arg5: memref<2x168x84xf32, #tpu.memory_space<vmem>>, %arg6: memref<5x84x160xf32, #tpu.memory_space<vmem>>, %arg7: memref<1x160xf32, #tpu.memory_space<vmem>>, %arg8: memref<2x5x10xf32, #tpu.memory_space<vmem>>, %arg9: memref<2x160x80xf32, #tpu.memory_space<vmem>>, %arg10: memref<5x80x128xf32, #tpu.memory_space<vmem>>, %arg11: memref<1x128xf32, #tpu.memory_space<vmem>>, %arg12: memref<1x1x128xf32, #tpu.memory_space<vmem>>, %arg13: memref<14x84xf32, #tpu.memory_space<vmem>>, %arg14: memref<5x80xf32, #tpu.memory_space<vmem>>) attributes {dimension_semantics = [#tpu.dimension_semantics<parallel>], iteration_bounds = array<i64: 2>, scalar_prefetch = 0 : i64, scratch_operands = 2 : i64, tpu.core_type = #tpu.core_type<tc>, window_params = [{transform_indices = @transform_0, window_bounds = array<i64: 1, 32, 96>}, {pipeline_mode = #tpu.pipeline_mode<synchronous>, transform_indices = @transform_1, window_bounds = array<i64: 5, 96, 168>}, {pipeline_mode = #tpu.pipeline_mode<synchronous>, transform_indices = @transform_2, window_bounds = array<i64: 1, 168>}, {pipeline_mode = #tpu.pipeline_mode<synchronous>, transform_indices = @transform_3, window_bounds = array<i64: 2, 14, 28>}, {pipeline_mode = #tpu.pipeline_mode<synchronous>, transform_indices = @transform_4, window_bounds = array<i64: 2, 168, 84>}, {pipeline_mode = #tpu.pipeline_mode<synchronous>, transform_indices = @transform_5, window_bounds = array<i64: 5, 84, 160>}, {pipeline_mode = #tpu.pipeline_mode<synchronous>, transform_indices = @transform_6, window_bounds = array<i64: 1, 160>}, {pipeline_mode = #tpu.pipeline_mode<synchronous>, transform_indices = @transform_7, window_bounds = array<i64: 2, 5, 10>}, {pipeline_mode = #tpu.pipeline_mode<synchronous>, transform_indices = @transform_8, window_bounds = array<i64: 2, 160, 80>}, {pipeline_mode = #tpu.pipeline_mode<synchronous>, transform_indices = @transform_9, window_bounds = array<i64: 5, 80, 128>}, {pipeline_mode = #tpu.pipeline_mode<synchronous>, transform_indices = @transform_10, window_bounds = array<i64: 1, 128>}, {transform_indices = @transform_11, window_bounds = array<i64: 1, 1, 128>}]} {
    %c0 = arith.constant 0 : index
    %c0_0 = arith.constant 0 : index
    %c0_1 = arith.constant 0 : index
    %0 = vector.load %arg1[%c0, %c0_0, %c0_1] : memref<1x32x96xf32, #tpu.memory_space<vmem>>, vector<1x28x96xf32>
    %1 = vector.shape_cast %0 : vector<1x28x96xf32> to vector<28x96xf32>
    %c0_2 = arith.constant 0 : index
    %c0_3 = arith.constant 0 : index
    %c0_4 = arith.constant 0 : index
    %2 = vector.load %arg2[%c0_2, %c0_3, %c0_4] : memref<5x96x168xf32, #tpu.memory_space<vmem>>, vector<1x96x168xf32>
    %3 = vector.shape_cast %2 : vector<1x96x168xf32> to vector<96x168xf32>
    %cst = arith.constant dense<0.000000e+00> : vector<28x168xf32>
    %4 = tpu.matmul %1, %3, %cst {dimension_numbers = #tpu.dot_dimension_numbers<[1], [0], [0], [1], [0, 0, 1, 1], [], []>} : vector<28x96xf32>, vector<96x168xf32>, vector<28x168xf32> -> vector<28x168xf32>
    %c0_5 = arith.constant 0 : index
    %c1 = arith.constant 1 : index
    %c0_6 = arith.constant 0 : index
    %5 = vector.load %arg1[%c0_5, %c1, %c0_6] : memref<1x32x96xf32, #tpu.memory_space<vmem>>, vector<1x28x96xf32>
    %6 = vector.shape_cast %5 : vector<1x28x96xf32> to vector<28x96xf32>
    %c1_7 = arith.constant 1 : index
    %c0_8 = arith.constant 0 : index
    %c0_9 = arith.constant 0 : index
    %7 = vector.load %arg2[%c1_7, %c0_8, %c0_9] : memref<5x96x168xf32, #tpu.memory_space<vmem>>, vector<1x96x168xf32>
    %8 = vector.shape_cast %7 : vector<1x96x168xf32> to vector<96x168xf32>
    %cst_10 = arith.constant dense<0.000000e+00> : vector<28x168xf32>
    %9 = tpu.matmul %6, %8, %cst_10 {dimension_numbers = #tpu.dot_dimension_numbers<[1], [0], [0], [1], [0, 0, 1, 1], [], []>} : vector<28x96xf32>, vector<96x168xf32>, vector<28x168xf32> -> vector<28x168xf32>
    %10 = arith.addf %4, %9 : vector<28x168xf32>
    %c0_11 = arith.constant 0 : index
    %c2 = arith.constant 2 : index
    %c0_12 = arith.constant 0 : index
    %11 = vector.load %arg1[%c0_11, %c2, %c0_12] : memref<1x32x96xf32, #tpu.memory_space<vmem>>, vector<1x28x96xf32>
    %12 = vector.shape_cast %11 : vector<1x28x96xf32> to vector<28x96xf32>
    %c2_13 = arith.constant 2 : index
    %c0_14 = arith.constant 0 : index
    %c0_15 = arith.constant 0 : index
    %13 = vector.load %arg2[%c2_13, %c0_14, %c0_15] : memref<5x96x168xf32, #tpu.memory_space<vmem>>, vector<1x96x168xf32>
    %14 = vector.shape_cast %13 : vector<1x96x168xf32> to vector<96x168xf32>
    %cst_16 = arith.constant dense<0.000000e+00> : vector<28x168xf32>
    %15 = tpu.matmul %12, %14, %cst_16 {dimension_numbers = #tpu.dot_dimension_numbers<[1], [0], [0], [1], [0, 0, 1, 1], [], []>} : vector<28x96xf32>, vector<96x168xf32>, vector<28x168xf32> -> vector<28x168xf32>
    %16 = arith.addf %10, %15 : vector<28x168xf32>
    %c0_17 = arith.constant 0 : index
    %c3 = arith.constant 3 : index
    %c0_18 = arith.constant 0 : index
    %17 = vector.load %arg1[%c0_17, %c3, %c0_18] : memref<1x32x96xf32, #tpu.memory_space<vmem>>, vector<1x28x96xf32>
    %18 = vector.shape_cast %17 : vector<1x28x96xf32> to vector<28x96xf32>
    %c3_19 = arith.constant 3 : index
    %c0_20 = arith.constant 0 : index
    %c0_21 = arith.constant 0 : index
    %19 = vector.load %arg2[%c3_19, %c0_20, %c0_21] : memref<5x96x168xf32, #tpu.memory_space<vmem>>, vector<1x96x168xf32>
    %20 = vector.shape_cast %19 : vector<1x96x168xf32> to vector<96x168xf32>
    %cst_22 = arith.constant dense<0.000000e+00> : vector<28x168xf32>
    %21 = tpu.matmul %18, %20, %cst_22 {dimension_numbers = #tpu.dot_dimension_numbers<[1], [0], [0], [1], [0, 0, 1, 1], [], []>} : vector<28x96xf32>, vector<96x168xf32>, vector<28x168xf32> -> vector<28x168xf32>
    %22 = arith.addf %16, %21 : vector<28x168xf32>
    %c0_23 = arith.constant 0 : index
    %c4 = arith.constant 4 : index
    %c0_24 = arith.constant 0 : index
    %23 = vector.load %arg1[%c0_23, %c4, %c0_24] : memref<1x32x96xf32, #tpu.memory_space<vmem>>, vector<1x28x96xf32>
    %24 = vector.shape_cast %23 : vector<1x28x96xf32> to vector<28x96xf32>
    %c4_25 = arith.constant 4 : index
    %c0_26 = arith.constant 0 : index
    %c0_27 = arith.constant 0 : index
    %25 = vector.load %arg2[%c4_25, %c0_26, %c0_27] : memref<5x96x168xf32, #tpu.memory_space<vmem>>, vector<1x96x168xf32>
    %26 = vector.shape_cast %25 : vector<1x96x168xf32> to vector<96x168xf32>
    %cst_28 = arith.constant dense<0.000000e+00> : vector<28x168xf32>
    %27 = tpu.matmul %24, %26, %cst_28 {dimension_numbers = #tpu.dot_dimension_numbers<[1], [0], [0], [1], [0, 0, 1, 1], [], []>} : vector<28x96xf32>, vector<96x168xf32>, vector<28x168xf32> -> vector<28x168xf32>
    %28 = arith.addf %22, %27 : vector<28x168xf32>
    %c0_29 = arith.constant 0 : index
    %c0_30 = arith.constant 0 : index
    %29 = vector.load %arg3[%c0_29, %c0_30] : memref<1x168xf32, #tpu.memory_space<vmem>>, vector<1x168xf32>
    %30 = vector.broadcast %29 : vector<1x168xf32> to vector<28x168xf32>
    %31 = arith.addf %28, %30 : vector<28x168xf32>
    %cst_31 = arith.constant 0.000000e+00 : f32
    %32 = vector.broadcast %cst_31 : f32 to vector<28x168xf32>
    %33 = arith.maximumf %31, %32 : vector<28x168xf32>
    %c0_32 = arith.constant 0 : index
    %c0_33 = arith.constant 0 : index
    %c0_34 = arith.constant 0 : index
    %34 = vector.load %arg4[%c0_32, %c0_33, %c0_34] : memref<2x14x28xf32, #tpu.memory_space<vmem>>, vector<1x14x28xf32>
    %35 = vector.shape_cast %34 : vector<1x14x28xf32> to vector<14x28xf32>
    %cst_35 = arith.constant dense<0.000000e+00> : vector<14x168xf32>
    %36 = tpu.matmul %35, %33, %cst_35 {dimension_numbers = #tpu.dot_dimension_numbers<[1], [0], [0], [1], [0, 0, 1, 1], [], []>} : vector<14x28xf32>, vector<28x168xf32>, vector<14x168xf32> -> vector<14x168xf32>
    %c1_36 = arith.constant 1 : index
    %c0_37 = arith.constant 0 : index
    %c0_38 = arith.constant 0 : index
    %37 = vector.load %arg4[%c1_36, %c0_37, %c0_38] : memref<2x14x28xf32, #tpu.memory_space<vmem>>, vector<1x14x28xf32>
    %38 = vector.shape_cast %37 : vector<1x14x28xf32> to vector<14x28xf32>
    %cst_39 = arith.constant dense<0.000000e+00> : vector<14x168xf32>
    %39 = tpu.matmul %38, %33, %cst_39 {dimension_numbers = #tpu.dot_dimension_numbers<[1], [0], [0], [1], [0, 0, 1, 1], [], []>} : vector<14x28xf32>, vector<28x168xf32>, vector<14x168xf32> -> vector<14x168xf32>
    %40 = arith.maximumf %36, %39 : vector<14x168xf32>
    %c0_40 = arith.constant 0 : index
    %c0_41 = arith.constant 0 : index
    %c0_42 = arith.constant 0 : index
    %41 = vector.load %arg5[%c0_40, %c0_41, %c0_42] : memref<2x168x84xf32, #tpu.memory_space<vmem>>, vector<1x168x84xf32>
    %42 = vector.shape_cast %41 : vector<1x168x84xf32> to vector<168x84xf32>
    %cst_43 = arith.constant dense<0.000000e+00> : vector<14x84xf32>
    %43 = tpu.matmul %40, %42, %cst_43 {dimension_numbers = #tpu.dot_dimension_numbers<[1], [0], [0], [1], [0, 0, 1, 1], [], []>} : vector<14x168xf32>, vector<168x84xf32>, vector<14x84xf32> -> vector<14x84xf32>
    %c1_44 = arith.constant 1 : index
    %c0_45 = arith.constant 0 : index
    %c0_46 = arith.constant 0 : index
    %44 = vector.load %arg5[%c1_44, %c0_45, %c0_46] : memref<2x168x84xf32, #tpu.memory_space<vmem>>, vector<1x168x84xf32>
    %45 = vector.shape_cast %44 : vector<1x168x84xf32> to vector<168x84xf32>
    %cst_47 = arith.constant dense<0.000000e+00> : vector<14x84xf32>
    %46 = tpu.matmul %40, %45, %cst_47 {dimension_numbers = #tpu.dot_dimension_numbers<[1], [0], [0], [1], [0, 0, 1, 1], [], []>} : vector<14x168xf32>, vector<168x84xf32>, vector<14x84xf32> -> vector<14x84xf32>
    %47 = arith.maximumf %43, %46 : vector<14x84xf32>
    %c0_48 = arith.constant 0 : index
    %c0_49 = arith.constant 0 : index
    %48 = vector.load %arg13[%c0_48, %c0_49] : memref<14x84xf32, #tpu.memory_space<vmem>>, vector<14x84xf32>
    tpu.vector_store %arg13[%c0_48, %c0_49], %47 {strides = array<i32>} : memref<14x84xf32, #tpu.memory_space<vmem>>, vector<14x84xf32>,
    %c0_50 = arith.constant 0 : index
    %c0_51 = arith.constant 0 : index
    %49 = vector.load %arg13[%c0_50, %c0_51] : memref<14x84xf32, #tpu.memory_space<vmem>>, vector<10x84xf32>
    %c0_52 = arith.constant 0 : index
    %c0_53 = arith.constant 0 : index
    %c0_54 = arith.constant 0 : index
    %50 = vector.load %arg6[%c0_52, %c0_53, %c0_54] : memref<5x84x160xf32, #tpu.memory_space<vmem>>, vector<1x84x160xf32>
    %51 = vector.shape_cast %50 : vector<1x84x160xf32> to vector<84x160xf32>
    %cst_55 = arith.constant dense<0.000000e+00> : vector<10x160xf32>
    %52 = tpu.matmul %49, %51, %cst_55 {dimension_numbers = #tpu.dot_dimension_numbers<[1], [0], [0], [1], [0, 0, 1, 1], [], []>} : vector<10x84xf32>, vector<84x160xf32>, vector<10x160xf32> -> vector<10x160xf32>
    %c1_56 = arith.constant 1 : index
    %c0_57 = arith.constant 0 : index
    %53 = vector.load %arg13[%c1_56, %c0_57] : memref<14x84xf32, #tpu.memory_space<vmem>>, vector<10x84xf32>
    %c1_58 = arith.constant 1 : index
    %c0_59 = arith.constant 0 : index
    %c0_60 = arith.constant 0 : index
    %54 = vector.load %arg6[%c1_58, %c0_59, %c0_60] : memref<5x84x160xf32, #tpu.memory_space<vmem>>, vector<1x84x160xf32>
    %55 = vector.shape_cast %54 : vector<1x84x160xf32> to vector<84x160xf32>
    %cst_61 = arith.constant dense<0.000000e+00> : vector<10x160xf32>
    %56 = tpu.matmul %53, %55, %cst_61 {dimension_numbers = #tpu.dot_dimension_numbers<[1], [0], [0], [1], [0, 0, 1, 1], [], []>} : vector<10x84xf32>, vector<84x160xf32>, vector<10x160xf32> -> vector<10x160xf32>
    %57 = arith.addf %52, %56 : vector<10x160xf32>
    %c2_62 = arith.constant 2 : index
    %c0_63 = arith.constant 0 : index
    %58 = vector.load %arg13[%c2_62, %c0_63] : memref<14x84xf32, #tpu.memory_space<vmem>>, vector<10x84xf32>
    %c2_64 = arith.constant 2 : index
    %c0_65 = arith.constant 0 : index
    %c0_66 = arith.constant 0 : index
    %59 = vector.load %arg6[%c2_64, %c0_65, %c0_66] : memref<5x84x160xf32, #tpu.memory_space<vmem>>, vector<1x84x160xf32>
    %60 = vector.shape_cast %59 : vector<1x84x160xf32> to vector<84x160xf32>
    %cst_67 = arith.constant dense<0.000000e+00> : vector<10x160xf32>
    %61 = tpu.matmul %58, %60, %cst_67 {dimension_numbers = #tpu.dot_dimension_numbers<[1], [0], [0], [1], [0, 0, 1, 1], [], []>} : vector<10x84xf32>, vector<84x160xf32>, vector<10x160xf32> -> vector<10x160xf32>
    %62 = arith.addf %57, %61 : vector<10x160xf32>
    %c3_68 = arith.constant 3 : index
    %c0_69 = arith.constant 0 : index
    %63 = vector.load %arg13[%c3_68, %c0_69] : memref<14x84xf32, #tpu.memory_space<vmem>>, vector<10x84xf32>
    %c3_70 = arith.constant 3 : index
    %c0_71 = arith.constant 0 : index
    %c0_72 = arith.constant 0 : index
    %64 = vector.load %arg6[%c3_70, %c0_71, %c0_72] : memref<5x84x160xf32, #tpu.memory_space<vmem>>, vector<1x84x160xf32>
    %65 = vector.shape_cast %64 : vector<1x84x160xf32> to vector<84x160xf32>
    %cst_73 = arith.constant dense<0.000000e+00> : vector<10x160xf32>
    %66 = tpu.matmul %63, %65, %cst_73 {dimension_numbers = #tpu.dot_dimension_numbers<[1], [0], [0], [1], [0, 0, 1, 1], [], []>} : vector<10x84xf32>, vector<84x160xf32>, vector<10x160xf32> -> vector<10x160xf32>
    %67 = arith.addf %62, %66 : vector<10x160xf32>
    %c4_74 = arith.constant 4 : index
    %c0_75 = arith.constant 0 : index
    %68 = vector.load %arg13[%c4_74, %c0_75] : memref<14x84xf32, #tpu.memory_space<vmem>>, vector<10x84xf32>
    %c4_76 = arith.constant 4 : index
    %c0_77 = arith.constant 0 : index
    %c0_78 = arith.constant 0 : index
    %69 = vector.load %arg6[%c4_76, %c0_77, %c0_78] : memref<5x84x160xf32, #tpu.memory_space<vmem>>, vector<1x84x160xf32>
    %70 = vector.shape_cast %69 : vector<1x84x160xf32> to vector<84x160xf32>
    %cst_79 = arith.constant dense<0.000000e+00> : vector<10x160xf32>
    %71 = tpu.matmul %68, %70, %cst_79 {dimension_numbers = #tpu.dot_dimension_numbers<[1], [0], [0], [1], [0, 0, 1, 1], [], []>} : vector<10x84xf32>, vector<84x160xf32>, vector<10x160xf32> -> vector<10x160xf32>
    %72 = arith.addf %67, %71 : vector<10x160xf32>
    %c0_80 = arith.constant 0 : index
    %c0_81 = arith.constant 0 : index
    %73 = vector.load %arg7[%c0_80, %c0_81] : memref<1x160xf32, #tpu.memory_space<vmem>>, vector<1x160xf32>
    %74 = vector.broadcast %73 : vector<1x160xf32> to vector<10x160xf32>
    %75 = arith.addf %72, %74 : vector<10x160xf32>
    %cst_82 = arith.constant 0.000000e+00 : f32
    %76 = vector.broadcast %cst_82 : f32 to vector<10x160xf32>
    %77 = arith.maximumf %75, %76 : vector<10x160xf32>
    %c0_83 = arith.constant 0 : index
    %c0_84 = arith.constant 0 : index
    %c0_85 = arith.constant 0 : index
    %78 = vector.load %arg8[%c0_83, %c0_84, %c0_85] : memref<2x5x10xf32, #tpu.memory_space<vmem>>, vector<1x5x10xf32>
    %79 = vector.shape_cast %78 : vector<1x5x10xf32> to vector<5x10xf32>
    %cst_86 = arith.constant dense<0.000000e+00> : vector<5x160xf32>
    %80 = tpu.matmul %79, %77, %cst_86 {dimension_numbers = #tpu.dot_dimension_numbers<[1], [0], [0], [1], [0, 0, 1, 1], [], []>} : vector<5x10xf32>, vector<10x160xf32>, vector<5x160xf32> -> vector<5x160xf32>
    %c1_87 = arith.constant 1 : index
    %c0_88 = arith.constant 0 : index
    %c0_89 = arith.constant 0 : index
    %81 = vector.load %arg8[%c1_87, %c0_88, %c0_89] : memref<2x5x10xf32, #tpu.memory_space<vmem>>, vector<1x5x10xf32>
    %82 = vector.shape_cast %81 : vector<1x5x10xf32> to vector<5x10xf32>
    %cst_90 = arith.constant dense<0.000000e+00> : vector<5x160xf32>
    %83 = tpu.matmul %82, %77, %cst_90 {dimension_numbers = #tpu.dot_dimension_numbers<[1], [0], [0], [1], [0, 0, 1, 1], [], []>} : vector<5x10xf32>, vector<10x160xf32>, vector<5x160xf32> -> vector<5x160xf32>
    %84 = arith.maximumf %80, %83 : vector<5x160xf32>
    %c0_91 = arith.constant 0 : index
    %c0_92 = arith.constant 0 : index
    %c0_93 = arith.constant 0 : index
    %85 = vector.load %arg9[%c0_91, %c0_92, %c0_93] : memref<2x160x80xf32, #tpu.memory_space<vmem>>, vector<1x160x80xf32>
    %86 = vector.shape_cast %85 : vector<1x160x80xf32> to vector<160x80xf32>
    %cst_94 = arith.constant dense<0.000000e+00> : vector<5x80xf32>
    %87 = tpu.matmul %84, %86, %cst_94 {dimension_numbers = #tpu.dot_dimension_numbers<[1], [0], [0], [1], [0, 0, 1, 1], [], []>} : vector<5x160xf32>, vector<160x80xf32>, vector<5x80xf32> -> vector<5x80xf32>
    %c1_95 = arith.constant 1 : index
    %c0_96 = arith.constant 0 : index
    %c0_97 = arith.constant 0 : index
    %88 = vector.load %arg9[%c1_95, %c0_96, %c0_97] : memref<2x160x80xf32, #tpu.memory_space<vmem>>, vector<1x160x80xf32>
    %89 = vector.shape_cast %88 : vector<1x160x80xf32> to vector<160x80xf32>
    %cst_98 = arith.constant dense<0.000000e+00> : vector<5x80xf32>
    %90 = tpu.matmul %84, %89, %cst_98 {dimension_numbers = #tpu.dot_dimension_numbers<[1], [0], [0], [1], [0, 0, 1, 1], [], []>} : vector<5x160xf32>, vector<160x80xf32>, vector<5x80xf32> -> vector<5x80xf32>
    %91 = arith.maximumf %87, %90 : vector<5x80xf32>
    %c0_99 = arith.constant 0 : index
    %c0_100 = arith.constant 0 : index
    %92 = vector.load %arg14[%c0_99, %c0_100] : memref<5x80xf32, #tpu.memory_space<vmem>>, vector<5x80xf32>
    tpu.vector_store %arg14[%c0_99, %c0_100], %91 {strides = array<i32>} : memref<5x80xf32, #tpu.memory_space<vmem>>, vector<5x80xf32>,
    %c0_101 = arith.constant 0 : index
    %c0_102 = arith.constant 0 : index
    %93 = vector.load %arg14[%c0_101, %c0_102] : memref<5x80xf32, #tpu.memory_space<vmem>>, vector<1x80xf32>
    %c0_103 = arith.constant 0 : index
    %c0_104 = arith.constant 0 : index
    %c0_105 = arith.constant 0 : index
    %94 = vector.load %arg10[%c0_103, %c0_104, %c0_105] : memref<5x80x128xf32, #tpu.memory_space<vmem>>, vector<1x80x128xf32>
    %95 = vector.shape_cast %94 : vector<1x80x128xf32> to vector<80x128xf32>
    %cst_106 = arith.constant dense<0.000000e+00> : vector<1x128xf32>
    %96 = tpu.matmul %93, %95, %cst_106 {dimension_numbers = #tpu.dot_dimension_numbers<[1], [0], [0], [1], [0, 0, 1, 1], [], []>} : vector<1x80xf32>, vector<80x128xf32>, vector<1x128xf32> -> vector<1x128xf32>
    %c1_107 = arith.constant 1 : index
    %c0_108 = arith.constant 0 : index
    %97 = vector.load %arg14[%c1_107, %c0_108] : memref<5x80xf32, #tpu.memory_space<vmem>>, vector<1x80xf32>
    %c1_109 = arith.constant 1 : index
    %c0_110 = arith.constant 0 : index
    %c0_111 = arith.constant 0 : index
    %98 = vector.load %arg10[%c1_109, %c0_110, %c0_111] : memref<5x80x128xf32, #tpu.memory_space<vmem>>, vector<1x80x128xf32>
    %99 = vector.shape_cast %98 : vector<1x80x128xf32> to vector<80x128xf32>
    %cst_112 = arith.constant dense<0.000000e+00> : vector<1x128xf32>
    %100 = tpu.matmul %97, %99, %cst_112 {dimension_numbers = #tpu.dot_dimension_numbers<[1], [0], [0], [1], [0, 0, 1, 1], [], []>} : vector<1x80xf32>, vector<80x128xf32>, vector<1x128xf32> -> vector<1x128xf32>
    %101 = arith.addf %96, %100 : vector<1x128xf32>
    %c2_113 = arith.constant 2 : index
    %c0_114 = arith.constant 0 : index
    %102 = vector.load %arg14[%c2_113, %c0_114] : memref<5x80xf32, #tpu.memory_space<vmem>>, vector<1x80xf32>
    %c2_115 = arith.constant 2 : index
    %c0_116 = arith.constant 0 : index
    %c0_117 = arith.constant 0 : index
    %103 = vector.load %arg10[%c2_115, %c0_116, %c0_117] : memref<5x80x128xf32, #tpu.memory_space<vmem>>, vector<1x80x128xf32>
    %104 = vector.shape_cast %103 : vector<1x80x128xf32> to vector<80x128xf32>
    %cst_118 = arith.constant dense<0.000000e+00> : vector<1x128xf32>
    %105 = tpu.matmul %102, %104, %cst_118 {dimension_numbers = #tpu.dot_dimension_numbers<[1], [0], [0], [1], [0, 0, 1, 1], [], []>} : vector<1x80xf32>, vector<80x128xf32>, vector<1x128xf32> -> vector<1x128xf32>
    %106 = arith.addf %101, %105 : vector<1x128xf32>
    %c3_119 = arith.constant 3 : index
    %c0_120 = arith.constant 0 : index
    %107 = vector.load %arg14[%c3_119, %c0_120] : memref<5x80xf32, #tpu.memory_space<vmem>>, vector<1x80xf32>
    %c3_121 = arith.constant 3 : index
    %c0_122 = arith.constant 0 : index
    %c0_123 = arith.constant 0 : index
    %108 = vector.load %arg10[%c3_121, %c0_122, %c0_123] : memref<5x80x128xf32, #tpu.memory_space<vmem>>, vector<1x80x128xf32>
    %109 = vector.shape_cast %108 : vector<1x80x128xf32> to vector<80x128xf32>
    %cst_124 = arith.constant dense<0.000000e+00> : vector<1x128xf32>
    %110 = tpu.matmul %107, %109, %cst_124 {dimension_numbers = #tpu.dot_dimension_numbers<[1], [0], [0], [1], [0, 0, 1, 1], [], []>} : vector<1x80xf32>, vector<80x128xf32>, vector<1x128xf32> -> vector<1x128xf32>
    %111 = arith.addf %106, %110 : vector<1x128xf32>
    %c4_125 = arith.constant 4 : index
    %c0_126 = arith.constant 0 : index
    %112 = vector.load %arg14[%c4_125, %c0_126] : memref<5x80xf32, #tpu.memory_space<vmem>>, vector<1x80xf32>
    %c4_127 = arith.constant 4 : index
    %c0_128 = arith.constant 0 : index
    %c0_129 = arith.constant 0 : index
    %113 = vector.load %arg10[%c4_127, %c0_128, %c0_129] : memref<5x80x128xf32, #tpu.memory_space<vmem>>, vector<1x80x128xf32>
    %114 = vector.shape_cast %113 : vector<1x80x128xf32> to vector<80x128xf32>
    %cst_130 = arith.constant dense<0.000000e+00> : vector<1x128xf32>
    %115 = tpu.matmul %112, %114, %cst_130 {dimension_numbers = #tpu.dot_dimension_numbers<[1], [0], [0], [1], [0, 0, 1, 1], [], []>} : vector<1x80xf32>, vector<80x128xf32>, vector<1x128xf32> -> vector<1x128xf32>
    %116 = arith.addf %111, %115 : vector<1x128xf32>
    %c0_131 = arith.constant 0 : index
    %c0_132 = arith.constant 0 : index
    %117 = vector.load %arg11[%c0_131, %c0_132] : memref<1x128xf32, #tpu.memory_space<vmem>>, vector<1x128xf32>
    %118 = arith.addf %116, %117 : vector<1x128xf32>
    %c0_133 = arith.constant 0 : index
    %c0_134 = arith.constant 0 : index
    %c0_135 = arith.constant 0 : index
    %119 = vector.load %arg12[%c0_133, %c0_134, %c0_135] : memref<1x1x128xf32, #tpu.memory_space<vmem>>, vector<1x1x128xf32>
    %120 = vector.shape_cast %119 : vector<1x1x128xf32> to vector<1x128xf32>
    %121 = vector.shape_cast %118 : vector<1x128xf32> to vector<1x1x128xf32>
    tpu.vector_store %arg12[%c0_133, %c0_134, %c0_135], %121 {strides = array<i32>} : memref<1x1x128xf32, #tpu.memory_space<vmem>>, vector<1x1x128xf32>,
    return
  }
  func.func @transform_0(%arg0: i32) -> (i32, i32, i32) {
    %c0_i32 = arith.constant 0 : i32
    %c0_i32_0 = arith.constant 0 : i32
    %c0_i32_1 = arith.constant 0 : i32
    return %arg0, %c0_i32, %c0_i32_0 : i32, i32, i32
  }
  func.func @transform_1(%arg0: i32) -> (i32, i32, i32) {
    %c0_i32 = arith.constant 0 : i32
    %c0_i32_0 = arith.constant 0 : i32
    %c0_i32_1 = arith.constant 0 : i32
    %c0_i32_2 = arith.constant 0 : i32
    return %c0_i32, %c0_i32_0, %c0_i32_1 : i32, i32, i32
  }
  func.func @transform_2(%arg0: i32) -> (i32, i32) {
    %c0_i32 = arith.constant 0 : i32
    %c0_i32_0 = arith.constant 0 : i32
    %c0_i32_1 = arith.constant 0 : i32
    return %c0_i32, %c0_i32_0 : i32, i32
  }
  func.func @transform_3(%arg0: i32) -> (i32, i32, i32) {
    %c0_i32 = arith.constant 0 : i32
    %c0_i32_0 = arith.constant 0 : i32
    %c0_i32_1 = arith.constant 0 : i32
    %c0_i32_2 = arith.constant 0 : i32
    return %c0_i32, %c0_i32_0, %c0_i32_1 : i32, i32, i32
  }
  func.func @transform_4(%arg0: i32) -> (i32, i32, i32) {
    %c0_i32 = arith.constant 0 : i32
    %c0_i32_0 = arith.constant 0 : i32
    %c0_i32_1 = arith.constant 0 : i32
    %c0_i32_2 = arith.constant 0 : i32
    return %c0_i32, %c0_i32_0, %c0_i32_1 : i32, i32, i32
  }
  func.func @transform_5(%arg0: i32) -> (i32, i32, i32) {
    %c0_i32 = arith.constant 0 : i32
    %c0_i32_0 = arith.constant 0 : i32
    %c0_i32_1 = arith.constant 0 : i32
    %c0_i32_2 = arith.constant 0 : i32
    return %c0_i32, %c0_i32_0, %c0_i32_1 : i32, i32, i32
  }
  func.func @transform_6(%arg0: i32) -> (i32, i32) {
    %c0_i32 = arith.constant 0 : i32
    %c0_i32_0 = arith.constant 0 : i32
    %c0_i32_1 = arith.constant 0 : i32
    return %c0_i32, %c0_i32_0 : i32, i32
  }
  func.func @transform_7(%arg0: i32) -> (i32, i32, i32) {
    %c0_i32 = arith.constant 0 : i32
    %c0_i32_0 = arith.constant 0 : i32
    %c0_i32_1 = arith.constant 0 : i32
    %c0_i32_2 = arith.constant 0 : i32
    return %c0_i32, %c0_i32_0, %c0_i32_1 : i32, i32, i32
  }
  func.func @transform_8(%arg0: i32) -> (i32, i32, i32) {
    %c0_i32 = arith.constant 0 : i32
    %c0_i32_0 = arith.constant 0 : i32
    %c0_i32_1 = arith.constant 0 : i32
    %c0_i32_2 = arith.constant 0 : i32
    return %c0_i32, %c0_i32_0, %c0_i32_1 : i32, i32, i32
  }
  func.func @transform_9(%arg0: i32) -> (i32, i32, i32) {
    %c0_i32 = arith.constant 0 : i32
    %c0_i32_0 = arith.constant 0 : i32
    %c0_i32_1 = arith.constant 0 : i32
    %c0_i32_2 = arith.constant 0 : i32
    return %c0_i32, %c0_i32_0, %c0_i32_1 : i32, i32, i32
  }
  func.func @transform_10(%arg0: i32) -> (i32, i32) {
    %c0_i32 = arith.constant 0 : i32
    %c0_i32_0 = arith.constant 0 : i32
    %c0_i32_1 = arith.constant 0 : i32
    return %c0_i32, %c0_i32_0 : i32, i32
  }
  func.func @transform_11(%arg0: i32) -> (i32, i32, i32) {
    %c0_i32 = arith.constant 0 : i32
    %c0_i32_0 = arith.constant 0 : i32
    %c0_i32_1 = arith.constant 0 : i32
    return %arg0, %c0_i32, %c0_i32_0 : i32, i32, i32
  }
}

</mosaic_0001>

<bundles_post_ra>
// kernel: tile.13
= control target key start
LH: loop header
LB: loop body
LE: loop exit
PB: predicated region body
PF: predicated region fallthrough
CT: control target
= control target key end

     0   :  { %s40_s0 = inlined_call_operand.vmem [shape: f32[6], index: 0, kind: input, shape index: {}]   ;;  %s41_s1 = inlined_call_operand.vmem [shape: f32[28,6], index: 1, kind: output, shape index: {}]  }
   0x1   :  { %v4_v0 = vld [vmem:[%s40_s0] ss:$0 sm:$0xff] }
   0x2   :  { %5 = vst [vmem:[%s41_s1] sm:$0xff] %v4_v0  ;;  %12 = vst [vmem:[%s41_s1 + $0x8] sm:$0xff] %v4_v0 }
   0x3   :  { %13 = vst [vmem:[%s41_s1 + $0x10] sm:$0xff] %v4_v0  ;;  %14 = vst [vmem:[%s41_s1 + $0x18] sm:$0xff] %v4_v0 }

// kernel: tile.14
= control target key start
LH: loop header
LB: loop body
LE: loop exit
PB: predicated region body
PF: predicated region fallthrough
CT: control target
= control target key end

     0   :  { %vm9_vm0 = vcmask 15360   ;;  %s247_s12 = smov 126   ;;  %s248_s13 = smov 114   ;;  %vm3_vm1 = vcmask 48128   ;;  %vm13_vm2 = vcmask 31744   ;;  %vm16_vm3 = vcmask 1048560   ;;  %s377_s0 = inlined_call_operand.vmem [shape: f32[28,6], index: 0, kind: input, shape index: {}]   ;;  %s378_s1 = inlined_call_operand.vmem [shape: f32[1,168], index: 1, kind: output, shape index: {}]  }
   0x1   :  { %v191_v0 = vld [vmem:[%s377_s0 + $0x15] sm:$0x1]   ;;  %v194_v3 = vld [vmem:[%s377_s0 + $0x13] sm:$0x1]   ;;  %v193_v4 = vld [vmem:[%s377_s0 + $0x14] sm:$0x1]  }
   0x2   :  { %v192_v1 = vld [vmem:[%s377_s0 + $0x15] sm:$0x1]   ;;  %26 = vrot.lane.b32.xlu1 %v194_v3, %s248_s13  ;;  %v195_v5 = vld [vmem:[%s377_s0 + $0x12] sm:$0x1]   ;;  %s249_s18 = smov 120   ;;  %s250_s19 = smov 108  }
   0x3   :  { %v10_v2 = vsel %vm9_vm0, %v192_v1, %v191_v0  ;;  %v196_v6 = vld [vmem:[%s377_s0 + $0x11] sm:$0x1]   ;;  %v197_v7 = vld [vmem:[%s377_s0 + $0x10] sm:$0x1]   ;;  %s251_s24 = smov 102   ;;  %s252_s25 = smov 96  }
   0x4   :  { %11 = vrot.lane.b32.xlu0 %v10_v2, %s247_s12  ;;  %v198_v8 = vld [vmem:[%s377_s0 + $0xf] sm:$0x1]   ;;  %v199_v9 = vld [vmem:[%s377_s0 + $0xe] sm:$0x1]   ;;  %s253_s30 = smov 90   ;;  %s254_s2 = smov 84  }
   0x5   :  { %v2_v10 = vld [vmem:[%s377_s0] sm:$0x1]   ;;  %v200_v11 = vld [vmem:[%s377_s0 + $0xd] sm:$0x1]   ;;  %v201_v12 = vld [vmem:[%s377_s0 + $0xc] sm:$0x1]  }
   0x6   :  { %32 = vrot.lane.b32.xlu1 %v195_v5, %s250_s19  ;;  %4 = vst.msk [vmem:[#allocation0] sm:$0x1] %vm3_vm1, %v2_v10   ;;  %s255_s9 = smov 78   ;;  %s256_s10 = smov 72   ;;  %v202_v13 = vld [vmem:[%s377_s0 + $0xb] sm:$0x1]  }
   0x7   :  { %v203_v14 = vld [vmem:[%s377_s0 + $0xa] sm:$0x1]   ;;  %s257_s15 = smov 66   ;;  %s258_s16 = smov 60   ;;  %v204_v15 = vld [vmem:[%s377_s0 + $0x9] sm:$0x1]  }
   0x8   :  { %20 = vrot.lane.b32.xlu0 %v193_v4, %s249_s18  ;;  %v205_v16 = vld [vmem:[%s377_s0 + $0x8] sm:$0x1]   ;;  %s259_s21 = smov 54   ;;  %s260_s22 = smov 48   ;;  %v206_v17 = vld [vmem:[%s377_s0 + $0x7] sm:$0x1]  }
   0x9   :  { %v207_v18 = vld [vmem:[%s377_s0 + $0x6] sm:$0x1]   ;;  %s261_s27 = smov 42   ;;  %s262_s28 = smov 36   ;;  %v208_v19 = vld [vmem:[%s377_s0 + $0x1b] sm:$0x1]  }
   0xa   :  { %44 = vrot.lane.b32.xlu1 %v197_v7, %s252_s25  ;;  %v209_v20 = vld [vmem:[%s377_s0 + $0x5] sm:$0x1]   ;;  %s263_s4 = smov 34   ;;  %s264_s5 = smov 30   ;;  %v210_v21 = vld [vmem:[%s377_s0 + $0x1a] sm:$0x1]  }
   0xb   :  { %v211_v22 = vld [vmem:[%s377_s0 + $0x4] sm:$0x1]   ;;  %s266_s11 = smov 24   ;;  %v212_v23 = vld [vmem:[%s377_s0 + $0x19] sm:$0x1]   ;;  %s268_s17 = smov 18  }
   0xc   :  { %38 = vrot.lane.b32.xlu0 %v196_v6, %s251_s24  ;;  %v213_v24 = vld [vmem:[%s377_s0 + $0x3] sm:$0x1]   ;;  %v214_v25 = vld [vmem:[%s377_s0 + $0x18] sm:$0x1]   ;;  %v215_v26 = vld [vmem:[%s377_s0 + $0x2] sm:$0x1]  }
   0xd   :  { %s270_s23 = smov 12   ;;  %v216_v27 = vld [vmem:[%s377_s0 + $0x17] sm:$0x1]   ;;  %v217_v28 = vld [vmem:[%s377_s0 + $0x1] sm:$0x1]   ;;  %s272_s29 = smov 6  }
   0xe   :  { %56 = vrot.lane.b32.xlu1 %v199_v9, %s254_s2  ;;  %v218_v29 = vld [vmem:[%s377_s0 + $0x16] sm:$0x1]   ;;  %s273_s0 = smov 4   ;;  %vm22_vm4 = vcmask 1032128   ;;  %vm28_vm5 = vcmask 982928   ;;  %vm34_vm6 = vcmask 933728  }
   0xf   :  { %vm40_vm7 = vcmask 884528   ;;  %vm46_vm8 = vcmask 835328   ;;  %vm52_vm9 = vcmask 786128   ;;  %vm58_vm10 = vcmask 736928  }
  0x10   :  { %50 = vrot.lane.b32.xlu0 %v198_v8, %s253_s30  ;;  %vm64_vm11 = vcmask 687728   ;;  %vm70_vm12 = vcmask 638528   ;;  %vm76_vm13 = vcmask 589328   ;;  %vm82_vm14 = vcmask 540128  }
  0x11   :  { %vm88_vm15 = vcmask 490928   ;;  %vm94_vm0 = vcmask 441728   ;;  %vm100_vm1 = vcmask 392528  }
  0x12   :  { %68 = vrot.lane.b32.xlu1 %v201_v12, %s256_s10  ;;  %s265_s10 = smov 28  }
  0x14   :  { %62 = vrot.lane.b32.xlu0 %v200_v11, %s255_s9 }
  0x16   :  { %80 = vrot.lane.b32.xlu1 %v203_v14, %s258_s16  ;;  %s267_s16 = smov 22  }
  0x18   :  { %74 = vrot.lane.b32.xlu0 %v202_v13, %s257_s15 }
  0x1a   :  { %92 = vrot.lane.b32.xlu1 %v205_v16, %s260_s22  ;;  %s269_s22 = smov 16  }
  0x1c   :  { %86 = vrot.lane.b32.xlu0 %v204_v15, %s259_s21 }
  0x1e   :  { %104 = vrot.lane.b32.xlu1 %v207_v18, %s262_s28  ;;  %s271_s28 = smov 10  }
  0x20   :  { %98 = vrot.lane.b32.xlu0 %v206_v17, %s261_s27 }
  0x22   :  { %117 = vrot.lane.b32.xlu1 %v209_v20, %s264_s5 }
  0x24   :  { %110 = vrot.lane.b32.xlu0 %v208_v19, %s263_s4 }
  0x26   :  { %130 = vrot.lane.b32.xlu1 %v211_v22, %s266_s11 }
  0x28   :  { %123 = vrot.lane.b32.xlu0 %v210_v21, %s265_s10 }
  0x2a   :  { %143 = vrot.lane.b32.xlu1 %v213_v24, %s268_s17 }
  0x2c   :  { %136 = vrot.lane.b32.xlu0 %v212_v23, %s267_s16 }
  0x2e   :  { %156 = vrot.lane.b32.xlu1 %v215_v26, %s270_s23 }
  0x30   :  { %149 = vrot.lane.b32.xlu0 %v214_v25, %s269_s22 }
  0x32   :  { %169 = vrot.lane.b32.xlu1 %v217_v28, %s272_s29 }
  0x34   :  { %162 = vrot.lane.b32.xlu0 %v216_v27, %s271_s28 }
  0x38   :  { %175 = vrot.lane.b32.xlu0 %v218_v29, %s273_s0 }
  0x74   :  { %v27_v31 = vpop.permute.xlu1 %26  }
  0x76   :  { %v12_v30 = vpop.permute.xlu0 %11  }
  0x77   :  { %15 = vst.msk [vmem:[#allocation0 + $0x8] sm:$0x1] %vm13_vm2, %v12_v30   ;;  %vm106_vm2 = vcmask 343328  }
  0x78   :  { %17 = vst.msk [vmem:[#allocation0] sm:$0x1] %vm16_vm3, %v12_v30   ;;  %v33_v33 = vpop.permute.xlu1 %32   ;;  %vm112_vm3 = vcmask 326928  }
  0x7a   :  { %v21_v32 = vpop.permute.xlu0 %20  }
  0x7b   :  { %23 = vst.msk [vmem:[#allocation0] sm:$0x1] %vm22_vm4, %v21_v32   ;;  %vm119_vm4 = vcmask 294128  }
  0x7c   :  { %29 = vst.msk [vmem:[#allocation0] sm:$0x1] %vm28_vm5, %v27_v31   ;;  %v45_v35 = vpop.permute.xlu1 %44   ;;  %vm125_vm5 = vcmask 277728  }
  0x7d   :  { %35 = vst.msk [vmem:[#allocation0] sm:$0x1] %vm34_vm6, %v33_v33   ;;  %vm132_vm6 = vcmask 244928  }
  0x7e   :  { %v39_v34 = vpop.permute.xlu0 %38  }
  0x7f   :  { %41 = vst.msk [vmem:[#allocation0] sm:$0x1] %vm40_vm7, %v39_v34   ;;  %vm138_vm7 = vcmask 228528  }
  0x80   :  { %47 = vst.msk [vmem:[#allocation0] sm:$0x1] %vm46_vm8, %v45_v35   ;;  %v57_v37 = vpop.permute.xlu1 %56   ;;  %vm145_vm8 = vcmask 195728  }
  0x82   :  { %v51_v36 = vpop.permute.xlu0 %50  }
  0x83   :  { %53 = vst.msk [vmem:[#allocation0] sm:$0x1] %vm52_vm9, %v51_v36   ;;  %vm151_vm9 = vcmask 179328  }
  0x84   :  { %59 = vst.msk [vmem:[#allocation0] sm:$0x1] %vm58_vm10, %v57_v37   ;;  %v69_v39 = vpop.permute.xlu1 %68   ;;  %vm158_vm10 = vcmask 146528  }
  0x86   :  { %v63_v38 = vpop.permute.xlu0 %62  }
  0x87   :  { %65 = vst.msk [vmem:[#allocation0] sm:$0x1] %vm64_vm11, %v63_v38   ;;  %vm164_vm11 = vcmask 130128  }
  0x88   :  { %71 = vst.msk [vmem:[#allocation0] sm:$0x1] %vm70_vm12, %v69_v39   ;;  %v81_v41 = vpop.permute.xlu1 %80   ;;  %vm171_vm12 = vcmask 97328  }
  0x8a   :  { %v75_v40 = vpop.permute.xlu0 %74  }
  0x8b   :  { %77 = vst.msk [vmem:[#allocation0] sm:$0x1] %vm76_vm13, %v75_v40   ;;  %vm177_vm13 = vcmask 80928  }
  0x8c   :  { %83 = vst.msk [vmem:[#allocation0] sm:$0x1] %vm82_vm14, %v81_v41   ;;  %v93_v43 = vpop.permute.xlu1 %92  }
  0x8e   :  { %v87_v42 = vpop.permute.xlu0 %86  }
  0x8f   :  { %89 = vst.msk [vmem:[#allocation0] sm:$0x1] %vm88_vm15, %v87_v42  }
  0x90   :  { %95 = vst.msk [vmem:[#allocation0] sm:$0x1] %vm94_vm0, %v93_v43   ;;  %v105_v45 = vpop.permute.xlu1 %104  }
  0x92   :  { %v99_v44 = vpop.permute.xlu0 %98  }
  0x93   :  { %101 = vst.msk [vmem:[#allocation0] sm:$0x1] %vm100_vm1, %v99_v44  }
  0x94   :  { %107 = vst.msk [vmem:[#allocation0] sm:$0x1] %vm106_vm2, %v105_v45   ;;  %v118_v47 = vpop.permute.xlu1 %117  }
  0x95   :  { %120 = vst.msk [vmem:[#allocation0] sm:$0x1] %vm119_vm4, %v118_v47  }
  0x96   :  { %v111_v46 = vpop.permute.xlu0 %110  }
  0x97   :  { %114 = vst.msk [vmem:[#allocation0 + $0x8] sm:$0x1] %vm112_vm3, %v111_v46  }
  0x98   :  { %v131_v49 = vpop.permute.xlu1 %130  }
  0x99   :  { %133 = vst.msk [vmem:[#allocation0] sm:$0x1] %vm132_vm6, %v131_v49  }
  0x9a   :  { %v124_v48 = vpop.permute.xlu0 %123  }
  0x9b   :  { %127 = vst.msk [vmem:[#allocation0 + $0x8] sm:$0x1] %vm125_vm5, %v124_v48  }
  0x9c   :  { %v144_v51 = vpop.permute.xlu1 %143  }
  0x9d   :  { %146 = vst.msk [vmem:[#allocation0] sm:$0x1] %vm145_vm8, %v144_v51  }
  0x9e   :  { %v137_v50 = vpop.permute.xlu0 %136  }
  0x9f   :  { %140 = vst.msk [vmem:[#allocation0 + $0x8] sm:$0x1] %vm138_vm7, %v137_v50  }
  0xa0   :  { %v157_v53 = vpop.permute.xlu1 %156  }
  0xa1   :  { %159 = vst.msk [vmem:[#allocation0] sm:$0x1] %vm158_vm10, %v157_v53  }
  0xa2   :  { %v150_v52 = vpop.permute.xlu0 %149  }
  0xa3   :  { %153 = vst.msk [vmem:[#allocation0 + $0x8] sm:$0x1] %vm151_vm9, %v150_v52  }
  0xa4   :  { %v170_v55 = vpop.permute.xlu1 %169  }
  0xa5   :  { %172 = vst.msk [vmem:[#allocation0] sm:$0x1] %vm171_vm12, %v170_v55  }
  0xa6   :  { %v163_v54 = vpop.permute.xlu0 %162  }
  0xa7   :  { %166 = vst.msk [vmem:[#allocation0 + $0x8] sm:$0x1] %vm164_vm11, %v163_v54  }
  0xaa   :  { %v176_v56 = vpop.permute.xlu0 %175  }
  0xab   :  { %179 = vst.msk [vmem:[#allocation0 + $0x8] sm:$0x1] %vm177_vm13, %v176_v56  }
  0xac   :  { %v183_v57 = vld [vmem:[#allocation0] sm:$0x1] }
  0xad   :  { %185 = vst [vmem:[%s378_s1] sm:$0x1] %v183_v57 }
  0xb2   :  { %v187_v58 = vld [vmem:[#allocation0 + $0x8] sm:$0x1] }
  0xb3   :  { %219 = vst [vmem:[%s378_s1 + $0x1] sm:$0x1] %v187_v58 }

// kernel: tile.18
= control target key start
LH: loop header
LB: loop body
LE: loop exit
PB: predicated region body
PF: predicated region fallthrough
CT: control target
= control target key end

     0   :  { %s28_s0 = inlined_call_operand.vmem [shape: f32[16], index: 0, kind: input, shape index: {}]   ;;  %s29_s1 = inlined_call_operand.vmem [shape: f32[10,16], index: 1, kind: output, shape index: {}]  }
   0x1   :  { %v4_v0 = vld [vmem:[%s28_s0] ss:$0 sm:$0xff] }
   0x2   :  { %5 = vst [vmem:[%s29_s1] sm:$0xff] %v4_v0  ;;  %8 = vst [vmem:[%s29_s1 + $0x8] sm:$0xff] %v4_v0 }

// kernel: tile.19
= control target key start
LH: loop header
LB: loop body
LE: loop exit
PB: predicated region body
PF: predicated region fallthrough
CT: control target
= control target key end

     0   :  { %s75_s10 = smov 112   ;;  %s76_s11 = smov 80   ;;  %vm4_vm0 = vcmask 130048   ;;  %vm10_vm1 = vcmask 1048448   ;;  %vm16_vm2 = vcmask 917248   ;;  %vm22_vm3 = vcmask 786048   ;;  %s122_s0 = inlined_call_operand.vmem [shape: f32[10,16], index: 0, kind: input, shape index: {}]   ;;  %s123_s1 = inlined_call_operand.vmem [shape: f32[1,160], index: 1, kind: output, shape index: {}]  }
   0x1   :  { %v60_v0 = vld [vmem:[%s122_s0 + $0x7] sm:$0x1]   ;;  %v62_v1 = vld [vmem:[%s122_s0 + $0x5] sm:$0x1]   ;;  %v61_v2 = vld [vmem:[%s122_s0 + $0x6] sm:$0x1]  }
   0x2   :  { %8 = vrot.lane.b32.xlu0 %v60_v0, %s75_s10  ;;  %20 = vrot.lane.b32.xlu1 %v62_v1, %s76_s11  ;;  %v63_v3 = vld [vmem:[%s122_s0 + $0x4] sm:$0x1]   ;;  %s2_s16 = smov 3  ;;  %s77_s17 = smov 96   ;;  %v64_v5 = vld [vmem:[%s122_s0 + $0x3] sm:$0x1]  }
   0x3   :  { %s78_s18 = smov 64   ;;  %v3_v4 = vld [vmem:[%s122_s0] ss:$8 sm:%s2_s16]   ;;  %v65_v6 = vld [vmem:[%s122_s0 + $0x2] sm:$0x1]   ;;  %s43_s25 = smov 3 }
   0x4   :  { %5 = vst.msk [vmem:[#allocation0] ss:$8 sm:$0x3] %vm4_vm0, %v3_v4   ;;  %s79_s26 = smov 48   ;;  %s80_s27 = smov 32   ;;  %vm28_vm4 = vcmask 654848  }
   0x5   :  { %v66_v7 = vld [vmem:[%s122_s0 + $0x1] ss:$8 sm:%s43_s25]   ;;  %s81_s0 = smov 16   ;;  %vm34_vm5 = vcmask 523648   ;;  %vm40_vm6 = vcmask 392448   ;;  %vm47_vm7 = vcmask 261248  }
   0x6   :  { %14 = vrot.lane.b32.xlu0 %v61_v2, %s77_s17  ;;  %26 = vrot.lane.b32.xlu1 %v63_v3, %s78_s18 }
   0xa   :  { %32 = vrot.lane.b32.xlu0 %v64_v5, %s79_s26  ;;  %38 = vrot.lane.b32.xlu1 %v65_v6, %s80_s27 }
   0xe   :  { %45 = vrot.lane.b32.xlu0 %v66_v7, %s81_s0 }
  0x74   :  { %v9_v8 = vpop.permute.xlu0 %8   ;;  %v21_v9 = vpop.permute.xlu1 %20  }
  0x75   :  { %11 = vst.msk [vmem:[#allocation0] sm:$0x1] %vm10_vm1, %v9_v8  }
  0x78   :  { %v15_v10 = vpop.permute.xlu0 %14   ;;  %v27_v11 = vpop.permute.xlu1 %26  }
  0x79   :  { %17 = vst.msk [vmem:[#allocation0] sm:$0x1] %vm16_vm2, %v15_v10  }
  0x7a   :  { %23 = vst.msk [vmem:[#allocation0] sm:$0x1] %vm22_vm3, %v21_v9  }
  0x7b   :  { %29 = vst.msk [vmem:[#allocation0] sm:$0x1] %vm28_vm4, %v27_v11  }
  0x7c   :  { %v33_v12 = vpop.permute.xlu0 %32   ;;  %v39_v13 = vpop.permute.xlu1 %38  }
  0x7d   :  { %35 = vst.msk [vmem:[#allocation0] sm:$0x1] %vm34_vm5, %v33_v12  }
  0x7e   :  { %41 = vst.msk [vmem:[#allocation0] sm:$0x1] %vm40_vm6, %v39_v13  }
  0x80   :  { %v46_v14 = vpop.permute.xlu0 %45  }
  0x81   :  { %48 = vst.msk [vmem:[#allocation0] ss:$8 sm:$0x3] %vm47_vm7, %v46_v14  }
  0x88   :  { %v52_v15 = vld [vmem:[#allocation0] sm:$0x1]  ;;  %v56_v16 = vld [vmem:[#allocation0 + $0x8] sm:$0x1] }
  0x89   :  { %54 = vst [vmem:[%s123_s1] sm:$0x1] %v52_v15  ;;  %67 = vst [vmem:[%s123_s1 + $0x1] sm:$0x1] %v56_v16 }

// kernel: neuralnet_forward.1
= control target key start
LH: loop header
LB: loop body
LE: loop exit
PB: predicated region body
PF: predicated region fallthrough
CT: control target
= control target key end

     0   :  { %16 = vsyncpa [#allocation5], 0  ;;  %s5525_s0 = inlined_call_operand.vmem [shape: f32[2,32,96], index: 0, kind: input, shape index: {}]   ;;  %s5526_s1 = inlined_call_operand.vmem [shape: f32[5,96,168], index: 1, kind: input, shape index: {}]   ;;  %s5527_s2 = inlined_call_operand.vmem [shape: f32[1,168], index: 2, kind: input, shape index: {}]   ;;  %s5528_s3 = inlined_call_operand.vmem [shape: f32[2,14,28], index: 3, kind: input, shape index: {}]   ;;  %s5529_s4 = inlined_call_operand.vmem [shape: f32[2,168,84], index: 4, kind: input, shape index: {}]   ;;  %s5530_s5 = inlined_call_operand.vmem [shape: f32[5,84,160], index: 5, kind: input, shape index: {}]   ;;  %s5531_s6 = inlined_call_operand.vmem [shape: f32[1,160], index: 6, kind: input, shape index: {}]   ;;  %s5532_s7 = inlined_call_operand.vmem [shape: f32[2,5,10], index: 7, kind: input, shape index: {}]   ;;  %s5533_s8 = inlined_call_operand.vmem [shape: f32[2,160,80], index: 8, kind: input, shape index: {}]   ;;  %s5534_s9 = inlined_call_operand.vmem [shape: f32[5,80,128], index: 9, kind: input, shape index: {}]   ;;  %s5535_s10 = inlined_call_operand.vmem [shape: f32[1,128], index: 10, kind: input, shape index: {}]   ;;  %s5536_s11 = inlined_call_operand.hbm [shape: f32[2,1,128], index: 11, kind: output, shape index: {}]  }
   0x1   :  { %18 = vsyncpa [#allocation5 + $0x1], 0  ;;  %s4104_s17 = smov 0   ;;  %s4106_s18 = smov 0  }
   0x2   :  { %s4108_s19 = smov 0   ;;  %s4110_s20 = smov 0  }
   0x3 LB: > { %5538 = sst [smem:[#allocation7_spill]] %s4033_s19  ;;  %s4125_s21 = sadd.s32 4294967295, %s4037_s20   ;;  %s4037_s20 = sphi %s4110_s20, %s5546_s20   ;;  %s4033_s19 = sphi %s4108_s19, %s5543_s19   ;;  %s4029_s18 = sphi %s4106_s18, %s5545_s18   ;;  %s4025_s17 = sphi %s4104_s17, %s5544_s17  }
   0x4   : > { %s2924_s22 = sadd.s32 4294967294, %s4037_s20   ;;  %s4129_s23 = sadd.s32 1, %s4037_s20  }
   0x5   : > { %s267_s24 = sadd.s32 1, %s4033_s19  ;;  %s264_s25 = ssub.s32 %s4037_s20, %s4129_s23 }
   0x6   : > { %p277_p0 = scmp.ne.s32.totalorder %s4033_s19, %s4029_s18  ;;  %p265_p1 = scmp.eq.s32.totalorder %s264_s25, 0 }
   0x7   : > { %p278_p2 = scmp.eq.s32.totalorder %s4125_s21, 1  ;;  %p283_p3 = scmp.ne.s32.totalorder %s4029_s18, %s4025_s17 }
   0x8   : > { %p284_p4 = scmp.eq.s32.totalorder %s2924_s22, 1  ;;  %p2927_p7 = scmp.ge.s32.totalorder %s4037_s20, 1 }
   0x9   : > { %s4140_s26 = scalar_select %p265_p1, %s4033_s19, %s267_s24  }
   0xa   : > { %p4142_p5 = por %p278_p2, %p277_p0  ;;  %p4146_p6 = por %p284_p4, %p283_p3 }
   0xb   : > { %5539 = sst [smem:[#allocation8_spill]] %s4140_s26  ;;  %p340_p8 = scmp.lt.s32.totalorder %s4037_s20, 3 }
   0xd   : > { %p341_p9 = pnand %p2927_p7, %p340_p8 }
   0xe   : > { %v2931_v0 = vld [vmem:[%s5526_s1 + $0xc8] sm:$0xff] (!%p341_p9)  ;;  %v2933_v1 = vld [vmem:[%s5526_s1 + $0xd8] sm:$0xff] (!%p341_p9)  ;;  %v2930_v2 = vld [vmem:[%s5526_s1 + $0xc0] sm:$0xff] (!%p341_p9)  ;;  %v4039_v7 = vmov (!%p341_p9), 0.0   ;;  %p379_p10 = scmp.lt.s32.totalorder (!%p341_p9), %s4125_s21, 1  ;;  %vm441_vm0 = vcmask (!%p341_p9), 785408  }
   0xf   : > { %344 = sbr.rel (%p341_p9) target bundleno = 1923 (0x783), region = 64  ;;  %v3437_v3 = vpack.c.bf16 (!%p341_p9), %v2933_v1, %v2931_v0  ;;  %v2932_v4 = vld [vmem:[%s5526_s1 + $0xd0] sm:$0xff] (!%p341_p9)  ;;  %v2935_v5 = vld [vmem:[%s5526_s1 + $0xe8] sm:$0xff] (!%p341_p9)  ;;  %v2937_v6 = vld [vmem:[%s5526_s1 + $0xf8] sm:$0xff] (!%p341_p9)  ;;  %518 = vmatprep.mubr.f32.mxu0 (!%p341_p9), %v4039_v7  ;;  %1252 = vmatprep.mubr.f32.mxu1 (!%p341_p9), %v4039_v7  ;;  %vm1095_vm1 = vcmask (!%p341_p9), 1043456   ;;  %vm4040_vm2 = vmmov (!%p341_p9), 1  }
  0x10   : > { %v3439_v8 = vpack.c.bf16 (!%p341_p9), %v2932_v4, %v2930_v2  ;;  %v3441_v9 = vpack.c.bf16 (!%p341_p9), %v2937_v6, %v2935_v5  ;;  %v2934_v10 = vld [vmem:[%s5526_s1 + $0xe0] sm:$0xff] (!%p341_p9)  ;;  %v2936_v11 = vld [vmem:[%s5526_s1 + $0xf0] sm:$0xff] (!%p341_p9)  ;;  %v2939_v12 = vld [vmem:[%s5526_s1 + $0x108] sm:$0xff] (!%p341_p9)  ;;  %vm1088_vm4 = vcmask (!%p341_p9), 228352   ;;  %vm1290_vm5 = vcmask (!%p341_p9), 326656   ;;  %s3263_s13 = sshll.u32 (!%p341_p9), %s4125_s21, 4 }
  0x11   : > { %3438 = vmatprep.subr.bf16.mxu0 (!%p341_p9), %v3437_v3  ;;  %v2941_v13 = vld [vmem:[%s5526_s1 + $0x118] sm:$0xff] (!%p341_p9)  ;;  %v3443_v14 = vpack.c.bf16 (!%p341_p9), %v2936_v11, %v2934_v10  ;;  %v2938_v16 = vld [vmem:[%s5526_s1 + $0x100] sm:$0xff] (!%p341_p9)  ;;  %v2940_v17 = vld [vmem:[%s5526_s1 + $0x110] sm:$0xff] (!%p341_p9)  ;;  %vm1471_vm6 = vcmask (!%p341_p9), 687104   ;;  %vm1473_vm7 = vcmask (!%p341_p9), 685056   ;;  %vm2081_vm8 = vcmask (!%p341_p9), 1041408   ;;  %s5483_s16 = scalar_lea.hbm (!%p341_p9), %s5536_s11, %s3263_s13 }
  0x12   : > { %3440 = vmatpush1.bf16.msra.mxu0 (!%p341_p9), %v3439_v8  ;;  %v3445_v15 = vpack.c.bf16 (!%p341_p9), %v2941_v13, %v2939_v12  ;;  %v2943_v18 = vld [vmem:[%s5526_s1 + $0x128] sm:$0xff] (!%p341_p9)  ;;  %v2945_v19 = vld [vmem:[%s5526_s1 + $0x138] sm:$0xff] (!%p341_p9)  ;;  %v3447_v20 = vpack.c.bf16 (!%p341_p9), %v2940_v17, %v2938_v16  ;;  %v2942_v22 = vld [vmem:[%s5526_s1 + $0x120] sm:$0xff] (!%p341_p9)  ;;  %vm2077_vm10 = vcmask (!%p341_p9), 80896   ;;  %vm2257_vm11 = vcmask (!%p341_p9), 261120  }
  0x13   : > { %3442 = vmatprep.subr.bf16.mxu0 (!%p341_p9), %v3441_v9  ;;  %v3449_v21 = vpack.c.bf16 (!%p341_p9), %v2945_v19, %v2943_v18  ;;  %v2944_v23 = vld [vmem:[%s5526_s1 + $0x130] sm:$0xff] (!%p341_p9)  ;;  %v2947_v24 = vld [vmem:[%s5526_s1 + $0x148] sm:$0xff] (!%p341_p9)  ;;  %v2949_v25 = vld [vmem:[%s5526_s1 + $0x158] sm:$0xff] (!%p341_p9)  ;;  %vm4042_vm12 = vmmov (!%p341_p9), 0   ;;  %vm2423_vm13 = vcmask (!%p341_p9), 651264   ;;  %vm2448_vm14 = vcmask (!%p341_p9), 654336  }
  0x14   : > { %v3451_v26 = vpack.c.bf16 (!%p341_p9), %v2944_v23, %v2942_v22  ;;  %v3453_v27 = vpack.c.bf16 (!%p341_p9), %v2949_v25, %v2947_v24  ;;  %v2946_v28 = vld [vmem:[%s5526_s1 + $0x140] sm:$0xff] (!%p341_p9)  ;;  %v2948_v29 = vld [vmem:[%s5526_s1 + $0x150] sm:$0xff] (!%p341_p9)  ;;  %v2951_v30 = vld [vmem:[%s5526_s1 + $0x168] sm:$0xff] (!%p341_p9) }
  0x15   : > { %v2953_v31 = vld [vmem:[%s5526_s1 + $0x178] sm:$0xff] (!%p341_p9)  ;;  %v3455_v32 = vpack.c.bf16 (!%p341_p9), %v2948_v29, %v2946_v28  ;;  %v2950_v34 = vld [vmem:[%s5526_s1 + $0x160] sm:$0xff] (!%p341_p9)  ;;  %v2952_v35 = vld [vmem:[%s5526_s1 + $0x170] sm:$0xff] (!%p341_p9) }
  0x16   : > { %3444 = vmatpush1.bf16.msra.mxu0 %v3443_v14  ;;  %s380_s29 = scalar_select %p379_p10, %s4125_s21, 1  ;;  %v3457_v33 = vpack.c.bf16 %v2953_v31, %v2951_v30  ;;  %v389_v36 = vld [vmem:[%s5526_s1 + $0x8] sm:$0xff]  ;;  %v391_v37 = vld [vmem:[%s5526_s1 + $0x18] sm:$0xff]  ;;  %v3459_v38 = vpack.c.bf16 %v2952_v35, %v2950_v34  ;;  %v388_v40 = vld [vmem:[%s5526_s1] sm:$0xff] }
  0x17   : > { %3446 = vmatprep.subr.bf16.mxu0 %v3445_v15  ;;  %v3461_v39 = vpack.c.bf16 %v391_v37, %v389_v36  ;;  %v390_v41 = vld [vmem:[%s5526_s1 + $0x10] sm:$0xff]  ;;  %v393_v42 = vld [vmem:[%s5526_s1 + $0x28] sm:$0xff]  ;;  %v395_v43 = vld [vmem:[%s5526_s1 + $0x38] sm:$0xff]  ;;  %s4043_s21 = smov [#allocation4]  }
  0x18   : > { %s3266_s24 = sshll.u32 %s380_s29, 5  ;;  %v3463_v45 = vpack.c.bf16 %v390_v41, %v388_v40  ;;  %v3465_v46 = vpack.c.bf16 %v395_v43, %v393_v42  ;;  %v392_v47 = vld [vmem:[%s5526_s1 + $0x20] sm:$0xff]  ;;  %v394_v48 = vld [vmem:[%s5526_s1 + $0x30] sm:$0xff]  ;;  %v397_v49 = vld [vmem:[%s5526_s1 + $0x48] sm:$0xff]  ;;  %s3979_s22 = sshll.u32 %s4043_s21, 4  ;;  %s3980_s22 = int_to_ptr.vmem [resolvable:$false] %s3979_s22 }
  0x19   : > { %s4237_s12 = scalar_lea.vmem %s5525_s0, %s3266_s24  ;;  %v399_v50 = vld [vmem:[%s5526_s1 + $0x58] sm:$0xff]  ;;  %v3467_v51 = vpack.c.bf16 %v394_v48, %v392_v47  ;;  %v396_v54 = vld [vmem:[%s5526_s1 + $0x40] sm:$0xff]  ;;  %v398_v55 = vld [vmem:[%s5526_s1 + $0x50] sm:$0xff]  ;;  %s377_s24 = sand.u32 1, %s4029_s18  }
  0x1a   : > { %3448 = vmatpush1.bf16.msra.mxu0 %v3447_v20  ;;  %v412_v44 = vld [vmem:[%s4237_s12 + $0x1] sm:$0xff]  ;;  %v413_v52 = vld [vmem:[%s4237_s12 + $0x9] sm:$0xff]  ;;  %v3469_v53 = vpack.c.bf16 %v399_v50, %v397_v49  ;;  %v403_v57 = vld [vmem:[%s5526_s1 + $0x78] sm:$0xff]  ;;  %v3471_v58 = vpack.c.bf16 %v398_v55, %v396_v54  ;;  %s378_s14 = scalar_lea.vmem [#allocation4], %s377_s24  ;;  %s2857_s26 = scalar_lea.sflag [#allocation5], %s377_s24 }
  0x1b   : > { %3450 = vmatprep.subr.bf16.mxu0 %v3449_v21  ;;  %v401_v56 = vld [vmem:[%s5526_s1 + $0x68] sm:$0xff]  ;;  %v414_v59 = vld [vmem:[%s4237_s12 + $0x11] sm:$0xff]  ;;  %v400_v61 = vld [vmem:[%s5526_s1 + $0x60] sm:$0xff]  ;;  %s2869_s15 = sshll.u32 %s378_s14, 4  ;;  %s3981_s25 = scalar_lea.vmem %s3980_s22, 32  ;;  %s5485_s15 = int_to_ptr.vmem [resolvable:$true] %s2869_s15 }
  0x1c   : > { %v3473_v60 = vpack.c.bf16 %v403_v57, %v401_v56  ;;  %v402_v62 = vld [vmem:[%s5526_s1 + $0x70] sm:$0xff]  ;;  %v405_v63 = vld [vmem:[%s5526_s1 + $0x88] sm:$0xff]  ;;  %v407_v0 = vld [vmem:[%s5526_s1 + $0x98] sm:$0xff]  ;;  %s3975_s29 = scalar_lea.vmem %s5485_s15, 16  ;;  %p3982_p0 = scmp.lt.s32.totalorder %s5485_s15, %s3980_s22 }
  0x1d   : > { %v3475_v1 = vpack.c.bf16 %v402_v62, %v400_v61  ;;  %v415_v2 = vld [vmem:[%s4237_s12 + $0x19] sm:$0xf]  ;;  %v3477_v3 = vpack.c.bf16 %v407_v0, %v405_v63  ;;  %v404_v4 = vld [vmem:[%s5526_s1 + $0x80] sm:$0xff]  ;;  %v406_v5 = vld [vmem:[%s5526_s1 + $0x90] sm:$0xff]  ;;  %p3976_p11 = scmp.ne.s32.totalorder %s5485_s15, %s3975_s29  ;;  %p3983_p1 = scmp.lt.s32.totalorder %s3981_s25, %s3975_s29 }
  0x1e   : > { %3452 = vmatpush1.bf16.msra.mxu0 %v3451_v26  ;;  %v409_v6 = vld [vmem:[%s5526_s1 + $0xa8] sm:$0xff]  ;;  %v411_v8 = vld [vmem:[%s5526_s1 + $0xb8] sm:$0xff]  ;;  %v3479_v9 = vpack.c.bf16 %v406_v5, %v404_v4  ;;  %v408_v11 = vld [vmem:[%s5526_s1 + $0xa0] sm:$0xff] }
  0x1f   : > { %3454 = vmatprep.subr.bf16.mxu0 %v3453_v27  ;;  %v3481_v10 = vpack.c.bf16 %v411_v8, %v409_v6  ;;  %v410_v12 = vld [vmem:[%s5526_s1 + $0xb0] sm:$0xff]  ;;  %v2963_v13 = vld [vmem:[%s5526_s1 + $0x188] sm:$0xff]  ;;  %v2965_v14 = vld [vmem:[%s5526_s1 + $0x198] sm:$0xff]  ;;  %p3977_p12 = pnand %p3976_p11, %p4142_p5  ;;  %p3984_p2 = por %p3983_p1, %p3982_p0 }
  0x20   : > { %v3483_v15 = vpack.c.bf16 %v410_v12, %v408_v11  ;;  %v3485_v16 = vpack.c.bf16 %v2965_v14, %v2963_v13  ;;  %v2962_v17 = vld [vmem:[%s5526_s1 + $0x180] sm:$0xff]  ;;  %v2964_v18 = vld [vmem:[%s5526_s1 + $0x190] sm:$0xff]  ;;  %v2967_v19 = vld [vmem:[%s5526_s1 + $0x1a8] sm:$0xff] }
  0x21   : > { %v2969_v20 = vld [vmem:[%s5526_s1 + $0x1b8] sm:$0xff]  ;;  %v384_v21 = vld [vmem:[%s4237_s12] sm:$0xff]  ;;  %v3487_v22 = vpack.c.bf16 %v2964_v18, %v2962_v17  ;;  %v2968_v25 = vld [vmem:[%s5526_s1 + $0x1b0] sm:$0xff]  ;;  %p3978_p13 = pneg %p3977_p12 }
  0x22   : > { %3456 = vmatpush1.bf16.msra.mxu0 %v3455_v32  ;;  %v3489_v23 = vpack.c.bf16 %v2969_v20, %v2967_v19  ;;  %v2966_v24 = vld [vmem:[%s5526_s1 + $0x1a0] sm:$0xff]  ;;  %v2971_v26 = vld [vmem:[%s5526_s1 + $0x1c8] sm:$0xff]  ;;  %v2973_v27 = vld [vmem:[%s5526_s1 + $0x1d8] sm:$0xff] }
  0x23   : > { %3458 = vmatprep.subr.bf16.mxu0 %v3457_v33  ;;  %v3491_v28 = vpack.c.bf16 %v2968_v25, %v2966_v24  ;;  %v385_v29 = vld [vmem:[%s4237_s12 + $0x8] sm:$0xff]  ;;  %v3493_v30 = vpack.c.bf16 %v2973_v27, %v2971_v26  ;;  %v2970_v31 = vld [vmem:[%s5526_s1 + $0x1c0] sm:$0xff]  ;;  %v2972_v32 = vld [vmem:[%s5526_s1 + $0x1d0] sm:$0xff]  ;;  %p3985_p3 = pnand %p3984_p2, %p3978_p13 }
  0x24   : > { %v2975_v33 = vld [vmem:[%s5526_s1 + $0x1e8] sm:$0xff]  ;;  %v2977_v34 = vld [vmem:[%s5526_s1 + $0x1f8] sm:$0xff]  ;;  %v3495_v35 = vpack.c.bf16 %v2972_v32, %v2970_v31  ;;  %v386_v36 = vld [vmem:[%s4237_s12 + $0x10] sm:$0xff] }
  0x25   : > { %v3497_v37 = vpack.c.bf16 %v2977_v34, %v2975_v33  ;;  %v2979_v40 = vld [vmem:[%s5526_s1 + $0x208] sm:$0xff]  ;;  %v2981_v41 = vld [vmem:[%s5526_s1 + $0x218] sm:$0xff]  ;;  %v2990_v57 = vld [vmem:[%s5526_s1 + $0x240] sm:$0xff] }
  0x26   : > { %3460 = vmatpush1.bf16.msra.mxu0 %v3459_v38  ;;  %v2974_v38 = vld [vmem:[%s5526_s1 + $0x1e0] sm:$0xff]  ;;  %v387_v43 = vld [vmem:[%s4237_s12 + $0x18] sm:$0xf]  ;;  %v2983_v47 = vld [vmem:[%s5526_s1 + $0x228] sm:$0xff] }
  0x27   : > { %3462 = vmatprep.subr.bf16.mxu0 %v3461_v39  ;;  %v2976_v39 = vld [vmem:[%s5526_s1 + $0x1f0] sm:$0xff]  ;;  %v2985_v48 = vld [vmem:[%s5526_s1 + $0x238] sm:$0xff]  ;;  %v644_v61 = vld [vmem:[%s4237_s12 + $0x2] sm:$0xff] }
  0x28   : > { %v3499_v42 = vpack.c.bf16 %v2976_v39, %v2974_v38  ;;  %v3505_v50 = vpack.c.bf16 %v2985_v48, %v2983_v47  ;;  %v2993_v54 = vld [vmem:[%s5526_s1 + $0x258] sm:$0xff]  ;;  %v2994_v0 = vld [vmem:[%s5526_s1 + $0x260] sm:$0xff]  ;;  %v645_v5 = vld [vmem:[%s4237_s12 + $0xa] sm:$0xff] }
  0x29   : > { %2954 = vmatmul.mubr.msk.f32.vlgmr.msra.gmra.mrb[0].mxu0 %vm441_vm0, %v412_v44  ;;  %v3501_v44 = vpack.c.bf16 %v2981_v41, %v2979_v40  ;;  %v2998_v8 = vld [vmem:[%s5526_s1 + $0x280] sm:$0xff]  ;;  %v3005_v11 = vld [vmem:[%s5526_s1 + $0x2b8] sm:$0xff]  ;;  %v3007_v17 = vld [vmem:[%s5526_s1 + $0x2c8] sm:$0xff] }
  0x2a   : > { %3464 = vmatpush1.bf16.msra.mxu0 %v3463_v45  ;;  %524 = vmatprep.mubr.f32.mxu0 %v4039_v7  ;;  %v2978_v45 = vld [vmem:[%s5526_s1 + $0x200] sm:$0xff]  ;;  %v646_v13 = vld [vmem:[%s4237_s12 + $0x12] sm:$0xff]  ;;  %v647_v20 = vld [vmem:[%s4237_s12 + $0x1a] sm:$0xf] }
  0x2b   : > { %3466 = vmatprep.subr.bf16.mxu0 %v3465_v46  ;;  %v2980_v46 = vld [vmem:[%s5526_s1 + $0x210] sm:$0xff]  ;;  %v3009_v18 = vld [vmem:[%s5526_s1 + $0x2d8] sm:$0xff]  ;;  %v3011_v24 = vld [vmem:[%s5526_s1 + $0x2e8] sm:$0xff] }
  0x2c   : > { %v3503_v49 = vpack.c.bf16 %v2980_v46, %v2978_v45  ;;  %v3013_v25 = vld [vmem:[%s5526_s1 + $0x2f8] sm:$0xff]  ;;  %v3018_v34 = vld [vmem:[%s5526_s1 + $0x300] sm:$0xff]  ;;  %v783_v46 = vld [vmem:[%s4237_s12 + $0xb] sm:$0xff] }
  0x2d   : > { %2955 = vmatmul.mubr.msk.f32.gmra.mrb[2].mxu0 %vm441_vm0, %v413_v52  ;;  %v2984_v52 = vld [vmem:[%s5526_s1 + $0x230] sm:$0xff]  ;;  %v3529_v27 = vpack.c.bf16 %v3013_v25, %v3011_v24  ;;  %v3021_v31 = vld [vmem:[%s5526_s1 + $0x318] sm:$0xff]  ;;  %v782_v38 = vld [vmem:[%s4237_s12 + $0x3] sm:$0xff] }
  0x2e   : > { %3468 = vmatpush1.bf16.msra.mxu0 %v3467_v51  ;;  %530 = vmatprep.mubr.f32.mxu0 %v4039_v7  ;;  %v2982_v51 = vld [vmem:[%s5526_s1 + $0x220] sm:$0xff]  ;;  %vm3562_vm3 = vmpackc.low %vm1095_vm1, %vm4040_vm2 }
  0x2f   : > { %3470 = vmatprep.subr.bf16.mxu0 %v3469_v53  ;;  %v2991_v53 = vld [vmem:[%s5526_s1 + $0x248] sm:$0xff]  ;;  %v3507_v55 = vpack.c.bf16 %v2984_v52, %v2982_v51  ;;  %v3022_v41 = vld [vmem:[%s5526_s1 + $0x320] sm:$0xff]  ;;  %v3033_v51 = vld [vmem:[%s5526_s1 + $0x378] sm:$0xff] }
  0x30   : > { %v3509_v56 = vpack.c.bf16 %v2993_v54, %v2991_v53  ;;  %v3026_v48 = vld [vmem:[%s5526_s1 + $0x340] sm:$0xff]  ;;  %v784_v53 = vld [vmem:[%s4237_s12 + $0x13] sm:$0xff]  ;;  %vm3738_vm9 = vmpackc.low %vm2081_vm8, %vm4040_vm2 }
  0x31   : > { %2956 = vmatmul.mubr.msk.f32.gmra.mrb[4].mxu0 %vm441_vm0, %v414_v59  ;;  %v2995_v59 = vld [vmem:[%s5526_s1 + $0x268] sm:$0xff] }
  0x32   : > { %3472 = vmatpush1.bf16.msra.mxu0 %v3471_v58  ;;  %536 = vmatprep.mubr.f32.mxu0 %v4039_v7  ;;  %v2992_v58 = vld [vmem:[%s5526_s1 + $0x250] sm:$0xff] }
  0x33   : > { %3474 = vmatprep.subr.bf16.mxu0 %v3473_v60  ;;  %v2997_v60 = vld [vmem:[%s5526_s1 + $0x278] sm:$0xff]  ;;  %v3511_v62 = vpack.c.bf16 %v2992_v58, %v2990_v57  ;;  %v3035_v57 = vld [vmem:[%s5526_s1 + $0x388] sm:$0xff] }
  0x34   : > { %v3513_v63 = vpack.c.bf16 %v2997_v60, %v2995_v59  ;;  %v3037_v58 = vld [vmem:[%s5526_s1 + $0x398] sm:$0xff] }
  0x35   : > { %2957 = vmatmul.mubr.msk.f32.gmra.mrb[6].mxu0 %vm441_vm0, %v415_v2  ;;  %v2999_v2 = vld [vmem:[%s5526_s1 + $0x288] sm:$0xff]  ;;  %v785_v60 = vld [vmem:[%s4237_s12 + $0x1b] sm:$0xf] }
  0x36   : > { %3476 = vmatpush1.bf16.msra.mxu0 %v3475_v1  ;;  %619 = vmatprep.mubr.f32.mxu0 %v4039_v7  ;;  %v2996_v1 = vld [vmem:[%s5526_s1 + $0x270] sm:$0xff] }
  0x37   : > { %3478 = vmatprep.subr.bf16.mxu0 %v3477_v3  ;;  %v3001_v3 = vld [vmem:[%s5526_s1 + $0x298] sm:$0xff]  ;;  %v3515_v4 = vpack.c.bf16 %v2996_v1, %v2994_v0  ;;  %v3039_v0 = vld [vmem:[%s5526_s1 + $0x3a8] sm:$0xff] }
  0x38   : > { %v3517_v6 = vpack.c.bf16 %v3001_v3, %v2999_v2  ;;  %v3041_v1 = vld [vmem:[%s5526_s1 + $0x3b8] sm:$0xff] }
  0x39   : > { %v3553_v3 = vpack.c.bf16 %v3041_v1, %v3039_v0  ;;  %v1277_v0 = vld [vmem:[%s5529_s4 + $0x40] sm:$0xff]  ;;  %v1278_v1 = vld [vmem:[%s5529_s4 + $0x48] sm:$0xff] }
  0x3a   : > { %3480 = vmatpush1.bf16.msra.mxu0 %v3479_v9  ;;  %v3000_v9 = vld [vmem:[%s5526_s1 + $0x290] sm:$0xff] }
  0x3b   : > { %3482 = vmatprep.subr.bf16.mxu0 %v3481_v10  ;;  %v3003_v10 = vld [vmem:[%s5526_s1 + $0x2a8] sm:$0xff]  ;;  %v3519_v12 = vpack.c.bf16 %v3000_v9, %v2998_v8 }
  0x3c   : > { %v3521_v14 = vpack.c.bf16 %v3005_v11, %v3003_v10  ;;  %v920_v8 = vld [vmem:[%s4237_s12 + $0x4] sm:$0xff]  ;;  %v921_v9 = vld [vmem:[%s4237_s12 + $0xc] sm:$0xff]  ;;  %v922_v10 = vld [vmem:[%s4237_s12 + $0x14] sm:$0xff] }
  0x3d   : > { %v923_v11 = vld [vmem:[%s4237_s12 + $0x1c] sm:$0xf] }
  0x3e   : > { %3484 = vmatpush1.bf16.msra.mxu0 %v3483_v15  ;;  %v3002_v15 = vld [vmem:[%s5526_s1 + $0x2a0] sm:$0xff] }
  0x3f   : > { %3486 = vmatprep.subr.bf16.mxu0 %v3485_v16  ;;  %v3004_v16 = vld [vmem:[%s5526_s1 + $0x2b0] sm:$0xff] }
  0x40   : > { %v3523_v19 = vpack.c.bf16 %v3004_v16, %v3002_v15  ;;  %v1058_v15 = vld [vmem:[%s5527_s2] sm:$0x3] }
  0x41   : > { %2958 = vmatmul.mubr.msk.f32.vlgmr.msra.gmra.mrb[0].mxu0 %vm441_vm0, %v384_v21  ;;  %v3525_v21 = vpack.c.bf16 %v3009_v18, %v3007_v17 }
  0x42   : > { %3488 = vmatpush1.bf16.msra.mxu0 %v3487_v22  ;;  %625 = vmatprep.mubr.f32.mxu0 %v4039_v7  ;;  %v3006_v22 = vld [vmem:[%s5526_s1 + $0x2c0] sm:$0xff] }
  0x43   : > { %3490 = vmatprep.subr.bf16.mxu0 %v3489_v23  ;;  %v3008_v23 = vld [vmem:[%s5526_s1 + $0x2d0] sm:$0xff] }
  0x44   : > { %v3527_v26 = vpack.c.bf16 %v3008_v23, %v3006_v22 }
  0x45   : > { %2959 = vmatmul.mubr.msk.f32.gmra.mrb[2].mxu0 %vm441_vm0, %v385_v29  ;;  %v3012_v29 = vld [vmem:[%s5526_s1 + $0x2f0] sm:$0xff] }
  0x46   : > { %3492 = vmatpush1.bf16.msra.mxu0 %v3491_v28  ;;  %631 = vmatprep.mubr.f32.mxu0 %v4039_v7  ;;  %v3010_v28 = vld [vmem:[%s5526_s1 + $0x2e0] sm:$0xff] }
  0x47   : > { %3494 = vmatprep.subr.bf16.mxu0 %v3493_v30  ;;  %v3019_v30 = vld [vmem:[%s5526_s1 + $0x308] sm:$0xff]  ;;  %v3531_v32 = vpack.c.bf16 %v3012_v29, %v3010_v28 }
  0x48   : > { %v3533_v33 = vpack.c.bf16 %v3021_v31, %v3019_v30 }
  0x49   : > { %2960 = vmatmul.mubr.msk.f32.gmra.mrb[4].mxu0 %vm441_vm0, %v386_v36  ;;  %v3023_v36 = vld [vmem:[%s5526_s1 + $0x328] sm:$0xff] }
  0x4a   : > { %3496 = vmatpush1.bf16.msra.mxu0 %v3495_v35  ;;  %637 = vmatprep.mubr.f32.mxu0 %v4039_v7  ;;  %v3020_v35 = vld [vmem:[%s5526_s1 + $0x310] sm:$0xff] }
  0x4b   : > { %3498 = vmatprep.subr.bf16.mxu0 %v3497_v37  ;;  %v3025_v37 = vld [vmem:[%s5526_s1 + $0x338] sm:$0xff]  ;;  %v3535_v39 = vpack.c.bf16 %v3020_v35, %v3018_v34 }
  0x4c   : > { %v3537_v40 = vpack.c.bf16 %v3025_v37, %v3023_v36 }
  0x4d   : > { %2961 = vmatmul.mubr.msk.f32.gmra.mrb[6].mxu0 %vm441_vm0, %v387_v43  ;;  %v3027_v43 = vld [vmem:[%s5526_s1 + $0x348] sm:$0xff] }
  0x4e   : > { %3500 = vmatpush1.bf16.msra.mxu0 %v3499_v42  ;;  %749 = vmatprep.mubr.f32.mxu0 %v4039_v7  ;;  %v3024_v42 = vld [vmem:[%s5526_s1 + $0x330] sm:$0xff] }
  0x4f   : > { %3502 = vmatprep.subr.bf16.mxu0 %v3501_v44  ;;  %v3029_v44 = vld [vmem:[%s5526_s1 + $0x358] sm:$0xff]  ;;  %v3539_v45 = vpack.c.bf16 %v3024_v42, %v3022_v41 }
  0x50   : > { %v3541_v47 = vpack.c.bf16 %v3029_v44, %v3027_v43 }
  0x52   : > { %3504 = vmatpush1.bf16.msra.mxu0 %v3503_v49  ;;  %v3028_v49 = vld [vmem:[%s5526_s1 + $0x350] sm:$0xff] }
  0x53   : > { %3506 = vmatprep.subr.bf16.mxu0 %v3505_v50  ;;  %v3031_v50 = vld [vmem:[%s5526_s1 + $0x368] sm:$0xff]  ;;  %v3543_v52 = vpack.c.bf16 %v3028_v49, %v3026_v48  ;;  %v1086_v49 = vld [vmem:[%s5528_s3] sm:$0xff] }
  0x54   : > { %v3545_v54 = vpack.c.bf16 %v3033_v51, %v3031_v50  ;;  %v1270_v48 = vld [vmem:[%s5529_s4 + $0x8] sm:$0xff]  ;;  %v3050_v50 = vld [vmem:[%s5528_s3 + $0x10] sm:$0xff]  ;;  %v4041_v51 = vmov 0.0|0.0  }
  0x56   : > { %3508 = vmatpush1.bf16.msra.mxu0 %v3507_v55  ;;  %v3030_v55 = vld [vmem:[%s5526_s1 + $0x360] sm:$0xff] }
  0x57   : > { %3510 = vmatprep.subr.bf16.mxu0 %v3509_v56  ;;  %v3032_v56 = vld [vmem:[%s5526_s1 + $0x370] sm:$0xff] }
  0x58   : > { %v3547_v59 = vpack.c.bf16 %v3032_v56, %v3030_v55  ;;  %v1087_v55 = vld [vmem:[%s5528_s3 + $0x8] sm:$0x3f]  ;;  %v3051_v56 = vld [vmem:[%s5528_s3 + $0x18] sm:$0x3f] }
  0x59   : > { %2986 = vmatmul.mubr.msk.f32.vlgmr.msra.gmra.mrb[0].mxu0 %vm441_vm0, %v644_v61  ;;  %v3549_v61 = vpack.c.bf16 %v3037_v58, %v3035_v57  ;;  %v1273_v58 = vld [vmem:[%s5529_s4 + $0x20] sm:$0xff] }
  0x5a   : > { %3512 = vmatpush1.bf16.msra.mxu0 %v3511_v62  ;;  %755 = vmatprep.mubr.f32.mxu0 %v4039_v7  ;;  %v3034_v62 = vld [vmem:[%s5526_s1 + $0x380] sm:$0xff] }
  0x5b   : > { %3514 = vmatprep.subr.bf16.mxu0 %v3513_v63  ;;  %v3036_v63 = vld [vmem:[%s5526_s1 + $0x390] sm:$0xff] }
  0x5c   : > { %v3551_v2 = vpack.c.bf16 %v3036_v63, %v3034_v62  ;;  %v1276_v62 = vld [vmem:[%s5529_s4 + $0x38] sm:$0xff] }
  0x5d   : > { %2987 = vmatmul.mubr.msk.f32.gmra.mrb[2].mxu0 %vm441_vm0, %v645_v5  ;;  %v3040_v5 = vld [vmem:[%s5526_s1 + $0x3b0] sm:$0xff] }
  0x5e   : > { %3516 = vmatpush1.bf16.msra.mxu0 %v3515_v4  ;;  %761 = vmatprep.mubr.f32.mxu0 %v4039_v7  ;;  %v3038_v4 = vld [vmem:[%s5526_s1 + $0x3a0] sm:$0xff] }
  0x5f   : > { %3518 = vmatprep.subr.bf16.mxu0 %v3517_v6  ;;  %v3555_v6 = vpack.c.bf16 %v3040_v5, %v3038_v4  ;;  %v1280_v4 = vld [vmem:[%s5529_s4 + $0x58] sm:$0xff] }
  0x61   : > { %2988 = vmatmul.mubr.msk.f32.gmra.mrb[4].mxu0 %vm441_vm0, %v646_v13 }
  0x62   : > { %3520 = vmatpush1.bf16.msra.mxu0 %v3519_v12  ;;  %767 = vmatprep.mubr.f32.mxu0 %v4039_v7  ;;  %v1060_v12 = vlaneseq }
  0x63   : > { %3522 = vmatprep.subr.bf16.mxu0 %v3521_v14 }
  0x64   : > { %v4581_v13 = vshrl.u32 %v1060_v12, 7 }
  0x65   : > { %2989 = vmatmul.mubr.msk.f32.gmra.mrb[6].mxu0 %vm441_vm0, %v647_v20 }
  0x66   : > { %3524 = vmatpush1.bf16.msra.mxu0 %v3523_v19  ;;  %887 = vmatprep.mubr.f32.mxu0 %v4039_v7  ;;  %v1062_v14 = vsub.s32 0, %v4581_v13  ;;  %v1066_v16 = vsub.s32 1, %v4581_v13  ;;  %v2076_v13 = vld [vmem:[%s5532_s7] sm:$0x1f] }
  0x67   : > { %3526 = vmatprep.subr.bf16.mxu0 %v3525_v21 }
  0x68   : > { %v1063_v17 = vrot.slane %v1058_v15, %v1062_v14  ;;  %v1067_v19 = vrot.slane %v1058_v15, %v1066_v16  ;;  %v1285_v15 = vld [vmem:[%s5529_s4 + $0x80] sm:$0xff] }
  0x6a   : > { %3528 = vmatpush1.bf16.msra.mxu0 %v3527_v26 }
  0x6b   : > { %3530 = vmatprep.subr.bf16.mxu0 %v3529_v27 }
  0x6e   : > { %3532 = vmatpush1.bf16.msra.mxu0 %v3531_v32 }
  0x6f   : > { %3534 = vmatprep.subr.bf16.mxu0 %v3533_v33 }
  0x71   : > { %3014 = vmatmul.mubr.msk.f32.vlgmr.msra.gmra.mrb[0].mxu0 %vm441_vm0, %v782_v38 }
  0x72   : > { %3536 = vmatpush1.bf16.msra.mxu0 %v3535_v39  ;;  %893 = vmatprep.mubr.f32.mxu0 %v4039_v7 }
  0x73   : > { %3538 = vmatprep.subr.bf16.mxu0 %v3537_v40 }
  0x75   : > { %3015 = vmatmul.mubr.msk.f32.gmra.mrb[2].mxu0 %vm441_vm0, %v783_v46 }
  0x76   : > { %3540 = vmatpush1.bf16.msra.mxu0 %v3539_v45  ;;  %899 = vmatprep.mubr.f32.mxu0 %v4039_v7 }
  0x77   : > { %3542 = vmatprep.subr.bf16.mxu0 %v3541_v47  ;;  %v1269_v47 = vld [vmem:[%s5529_s4] sm:$0xff] }
  0x79   : > { %3016 = vmatmul.mubr.msk.f32.gmra.mrb[4].mxu0 %vm441_vm0, %v784_v53  ;;  %v1271_v53 = vld [vmem:[%s5529_s4 + $0x10] sm:$0xff] }
  0x7a   : > { %3544 = vmatpush1.bf16.msra.mxu0 %v3543_v52  ;;  %905 = vmatprep.mubr.f32.mxu0 %v4039_v7  ;;  %v3578_v52 = vpack.c.bf16 %v1270_v48, %v1269_v47  ;;  %v3066_v47 = vld [vmem:[%s5529_s4 + $0xe8] sm:$0xff]  ;;  %v3067_v48 = vld [vmem:[%s5529_s4 + $0xf0] sm:$0xff] }
  0x7b   : > { %3546 = vmatprep.subr.bf16.mxu0 %v3545_v54  ;;  %v1272_v54 = vld [vmem:[%s5529_s4 + $0x18] sm:$0xff] }
  0x7c   : > { %v3581_v57 = vpack.c.bf16 %v1272_v54, %v1271_v53  ;;  %v3070_v54 = vld [vmem:[%s5529_s4 + $0x108] sm:$0xff] }
  0x7d   : > { %3017 = vmatmul.mubr.msk.f32.gmra.mrb[6].mxu0 %vm441_vm0, %v785_v60 }
  0x7e   : > { %3548 = vmatpush1.bf16.msra.mxu0 %v3547_v59  ;;  %1025 = vmatprep.mubr.f32.mxu0 %v4039_v7  ;;  %v1274_v59 = vld [vmem:[%s5529_s4 + $0x28] sm:$0xff] }
  0x7f   : > { %3550 = vmatprep.subr.bf16.mxu0 %v3549_v61  ;;  %v3584_v60 = vpack.c.bf16 %v1274_v59, %v1273_v58  ;;  %v1275_v61 = vld [vmem:[%s5529_s4 + $0x30] sm:$0xff]  ;;  %v3073_v58 = vld [vmem:[%s5529_s4 + $0x120] sm:$0xff] }
  0x80   : > { %v3587_v63 = vpack.c.bf16 %v1276_v62, %v1275_v61  ;;  %v3075_v61 = vld [vmem:[%s5529_s4 + $0x130] sm:$0xff] }
  0x82   : > { %3552 = vmatpush1.bf16.msra.mxu0 %v3551_v2  ;;  %v3590_v2 = vpack.c.bf16 %v1278_v1, %v1277_v0  ;;  %v3077_v0 = vld [vmem:[%s5529_s4 + $0x140] sm:$0xff] }
  0x83   : > { %3554 = vmatprep.subr.bf16.mxu0 %v3553_v3  ;;  %v1279_v3 = vld [vmem:[%s5529_s4 + $0x50] sm:$0xff] }
  0x84   : > { %v3593_v5 = vpack.c.bf16 %v1280_v4, %v1279_v3  ;;  %v3082_v3 = vld [vmem:[%s5530_s5 + $0xb8] sm:$0xff]  ;;  %v3084_v4 = vld [vmem:[%s5530_s5 + $0xc8] sm:$0xff] }
  0x86   : > { %3556 = vmatpush1.bf16.msra.mxu0 %v3555_v6  ;;  %v1281_v6 = vld [vmem:[%s5529_s4 + $0x60] sm:$0xff] }
  0x89   : > { %3042 = vmatmul.mubr.msk.f32.vlgmr.msra.gmra.mrb[0].mxu0 %vm441_vm0, %v920_v8  ;;  %v1282_v8 = vld [vmem:[%s5529_s4 + $0x68] sm:$0xff] }
  0x8a   : > { %1031 = vmatprep.mubr.f32.mxu0 %v4039_v7 }
  0x8d   : > { %3043 = vmatmul.mubr.msk.f32.gmra.mrb[2].mxu0 %vm441_vm0, %v921_v9  ;;  %v3596_v9 = vpack.c.bf16 %v1282_v8, %v1281_v6  ;;  %v3081_v6 = vld [vmem:[%s5530_s5 + $0xb0] sm:$0xff]  ;;  %v3083_v8 = vld [vmem:[%s5530_s5 + $0xc0] sm:$0xff] }
  0x8e   : > { %1037 = vmatprep.mubr.f32.mxu0 %v4039_v7 }
  0x91   : > { %3044 = vmatmul.mubr.msk.f32.gmra.mrb[4].mxu0 %vm441_vm0, %v922_v10  ;;  %v1283_v10 = vld [vmem:[%s5529_s4 + $0x70] sm:$0xff] }
  0x92   : > { %1043 = vmatprep.mubr.f32.mxu0 %v4039_v7 }
  0x95   : > { %3045 = vmatmul.mubr.msk.f32.gmra.mrb[6].mxu0 %vm441_vm0, %v923_v11  ;;  %v1284_v11 = vld [vmem:[%s5529_s4 + $0x78] sm:$0xff] }
  0x96   : > { %1166 = vmatprep.mubr.f32.mxu0 %v4039_v7  ;;  %v3599_v12 = vpack.c.bf16 %v1284_v11, %v1283_v10  ;;  %v3086_v10 = vld [vmem:[%s5530_s5 + $0xd8] sm:$0xff]  ;;  %v3088_v11 = vld [vmem:[%s5530_s5 + $0xe8] sm:$0xff] }
 0x15c   : > { %v1027_v18 = vpop.f32.mrb[0].mxu0 }
 0x15d   : > { %v1029_v20 = vpop.f32.mrb[1].mxu0  ;;  %v1070_v21 = vadd.f32 %v1063_v17, %v1027_v18 }
 0x15e   : > { %v1071_v22 = vadd.f32 %v1067_v19, %v1029_v20  ;;  %v1288_v20 = vld [vmem:[%s5529_s4 + $0x98] sm:$0xff] }
 0x15f   : > { %v1078_v27 = vmax.f32 %v1070_v21, 0.0 }
 0x160   : > { %v1033_v23 = vpop.f32.mrb[2].mxu0  ;;  %v1079_v29 = vmax.f32 %v1071_v22, 0.0  ;;  %v1289_v22 = vld [vmem:[%s5529_s4 + $0xa0] sm:$0xff] }
 0x161   : > { %v1072_v24 = vadd.f32 %v1063_v17, %v1033_v23  ;;  %v1035_v25 = vpop.f32.mrb[3].mxu0  ;;  %v3058_v23 = vld [vmem:[%s5529_s4 + $0xa8] sm:$0xff] }
 0x162   : > { %v1073_v26 = vadd.f32 %v1067_v19, %v1035_v25 }
 0x163   : > { %v1080_v28 = vmax.f32 %v1072_v24, 0.0  ;;  %v3059_v24 = vld [vmem:[%s5529_s4 + $0xb0] sm:$0xff] }
 0x164   : > { %v1081_v30 = vmax.f32 %v1073_v26, 0.0  ;;  %v1039_v31 = vpop.f32.mrb[4].mxu0 }
 0x165   : > { %v3559_v32 = vpack.c.bf16 %v1080_v28, %v1078_v27  ;;  %v1041_v33 = vpop.f32.mrb[5].mxu0  ;;  %v1074_v35 = vadd.f32 %v1063_v17, %v1039_v31  ;;  %v3608_v31 = vpack.c.bf16 %v3059_v24, %v3058_v23  ;;  %v3091_v23 = vld [vmem:[%s5530_s5 + $0x100] sm:$0xff] }
 0x166   : > { %v3557_v34 = vpack.c.bf16 %v1081_v30, %v1079_v29  ;;  %v1075_v36 = vadd.f32 %v1067_v19, %v1041_v33  ;;  %v3061_v33 = vld [vmem:[%s5529_s4 + $0xc0] sm:$0xff] }
 0x167   : > { %v1082_v41 = vmax.f32 %v1074_v35, 0.0 }
 0x168   : > { %v1045_v37 = vpop.f32.mrb[6].mxu0  ;;  %3558 = vmatprep.subr.bf16.mxu0 %v3557_v34  ;;  %3568 = vmatprep.subr.bf16.mxu1 %v3557_v34  ;;  %v1083_v43 = vmax.f32 %v1075_v36, 0.0 }
 0x169   : > { %v1076_v38 = vadd.f32 %v1063_v17, %v1045_v37  ;;  %v1047_v39 = vpop.f32.mrb[7].mxu0  ;;  %3560 = vmatpush1.bf16.msra.mxu0 %v3559_v32  ;;  %3570 = vmatpush1.bf16.msra.mxu1 %v3559_v32  ;;  %v1286_v17 = vld [vmem:[%s5529_s4 + $0x88] sm:$0xff]  ;;  %v3060_v32 = vld [vmem:[%s5529_s4 + $0xb8] sm:$0xff] }
 0x16a   : > { %v1077_v40 = vadd.f32 %v1067_v19, %v1047_v39  ;;  %v3602_v18 = vpack.c.bf16 %v1286_v17, %v1285_v15  ;;  %v1287_v19 = vld [vmem:[%s5529_s4 + $0x90] sm:$0xff]  ;;  %v3641_v15 = vpack.c.bf16 %v3088_v11, %v3086_v10  ;;  %v3087_v17 = vld [vmem:[%s5530_s5 + $0xe0] sm:$0xff] }
 0x16b   : > { %v1084_v42 = vmax.f32 %v1076_v38, 0.0  ;;  %v3605_v21 = vpack.c.bf16 %v1288_v20, %v1287_v19  ;;  %v3090_v19 = vld [vmem:[%s5530_s5 + $0xf8] sm:$0xff]  ;;  %v3092_v20 = vld [vmem:[%s5530_s5 + $0x108] sm:$0xff]  ;;  %v1489_v10 = vld [vmem:[%s5530_s5 + $0x60] sm:$0xff] }
 0x16c   : > { %v1085_v44 = vmax.f32 %v1077_v40, 0.0  ;;  %v3611_v40 = vpack.c.bf16 %v3061_v33, %v3060_v32  ;;  %v3100_v32 = vld [vmem:[%s5530_s5 + $0x148] sm:$0xff]  ;;  %v1491_v11 = vld [vmem:[%s5530_s5 + $0x70] sm:$0xff] }
 0x16d   : > { %v3564_v45 = vpack.c.bf16 %v1084_v42, %v1082_v41  ;;  %v3062_v41 = vld [vmem:[%s5529_s4 + $0xc8] sm:$0xff]  ;;  %v3063_v42 = vld [vmem:[%s5529_s4 + $0xd0] sm:$0xff] }
 0x16e   : > { %v3561_v46 = vpack.c.bf16 %v1085_v44, %v1083_v43  ;;  %v3614_v43 = vpack.c.bf16 %v3063_v42, %v3062_v41  ;;  %v3064_v44 = vld [vmem:[%s5529_s4 + $0xd8] sm:$0xff] }
 0x170   : > { %3563 = vmatprep.subr.msk.bf16.mxu0 %vm3562_vm3, %v3561_v46  ;;  %3573 = vmatprep.subr.msk.bf16.mxu1 %vm3562_vm3, %v3561_v46 }
 0x171   : > { %3566 = vmatpush1.bf16.msk.msra.mxu0 %vm3562_vm3, %v3564_v45  ;;  %3576 = vmatpush1.bf16.msk.msra.mxu1 %vm3562_vm3, %v3564_v45  ;;  %v3065_v45 = vld [vmem:[%s5529_s4 + $0xe0] sm:$0xff] }
 0x172   : > { %3577 = vmatprep.subr.bf16.mxu1 %v4041_v51  ;;  %v3617_v46 = vpack.c.bf16 %v3065_v45, %v3064_v44 }
 0x174   : > { %3048 = vmatmul.mubr.msk.f32.vlgmr.msra.gmra.mrb[8].mxu0 %vm1088_vm4, %v1086_v49  ;;  %3054 = vmatmul.mubr.msk.f32.vlgmr.msra.gmra.mrb[0].mxu1 %vm1088_vm4, %v3050_v50  ;;  %v3620_v49 = vpack.c.bf16 %v3067_v48, %v3066_v47  ;;  %v3068_v50 = vld [vmem:[%s5529_s4 + $0xf8] sm:$0xff] }
 0x175   : > { %1172 = vmatprep.mubr.f32.mxu0 %v4039_v7  ;;  %1258 = vmatprep.mubr.f32.mxu1 %v4039_v7 }
 0x176   : > { %3579 = vmatpush1.bf16.msra.mxu1 %v3578_v52  ;;  %v3069_v52 = vld [vmem:[%s5529_s4 + $0x100] sm:$0xff] }
 0x177   : > { %3580 = vmatprep.subr.bf16.mxu1 %v4041_v51  ;;  %v3623_v53 = vpack.c.bf16 %v3069_v52, %v3068_v50 }
 0x178   : > { %3049 = vmatmul.mubr.msk.f32.gmra.mrb[10].mxu0 %vm1088_vm4, %v1087_v55  ;;  %3055 = vmatmul.mubr.msk.f32.gmra.mrb[2].mxu1 %vm1088_vm4, %v3051_v56  ;;  %v3071_v55 = vld [vmem:[%s5529_s4 + $0x110] sm:$0xff] }
 0x179   : > { %2152 = vmatprep.mubr.f32.mxu0 %v4039_v7  ;;  %v3626_v56 = vpack.c.bf16 %v3071_v55, %v3070_v54  ;;  %v1479_v54 = vld [vmem:[%s5530_s5 + $0x10] sm:$0xff]  ;;  %v1482_v55 = vld [vmem:[%s5530_s5 + $0x28] sm:$0xff] }
 0x17a   : > { %3582 = vmatpush1.bf16.msra.mxu1 %v3581_v57  ;;  %v3072_v57 = vld [vmem:[%s5529_s4 + $0x118] sm:$0xff] }
 0x17b   : > { %3583 = vmatprep.subr.bf16.mxu1 %v4041_v51  ;;  %v3629_v59 = vpack.c.bf16 %v3073_v58, %v3072_v57 }
 0x17e   : > { %3585 = vmatpush1.bf16.msra.mxu1 %v3584_v60  ;;  %v3074_v60 = vld [vmem:[%s5529_s4 + $0x128] sm:$0xff] }
 0x17f   : > { %3586 = vmatprep.subr.bf16.mxu1 %v4041_v51  ;;  %v3632_v62 = vpack.c.bf16 %v3075_v61, %v3074_v60  ;;  %v1483_v60 = vld [vmem:[%s5530_s5 + $0x30] sm:$0xff] }
 0x182   : > { %3588 = vmatpush1.bf16.msra.mxu1 %v3587_v63  ;;  %v3076_v63 = vld [vmem:[%s5529_s4 + $0x138] sm:$0xff] }
 0x183   : > { %3589 = vmatprep.subr.bf16.mxu1 %v4041_v51  ;;  %v3635_v1 = vpack.c.bf16 %v3077_v0, %v3076_v63  ;;  %v1488_v63 = vld [vmem:[%s5530_s5 + $0x58] sm:$0xff] }
 0x186   : > { %3591 = vmatpush1.bf16.msra.mxu1 %v3590_v2  ;;  %v3078_v2 = vld [vmem:[%s5529_s4 + $0x148] sm:$0xff] }
 0x187   : > { %3592 = vmatprep.subr.bf16.mxu1 %v4041_v51 }
 0x18a   : > { %3594 = vmatpush1.bf16.msra.mxu1 %v3593_v5  ;;  %v3637_v5 = vpack.c.bf16 %v3084_v4, %v3082_v3  ;;  %v1487_v3 = vld [vmem:[%s5530_s5 + $0x50] sm:$0xff] }
 0x18b   : > { %3595 = vmatprep.subr.bf16.mxu1 %v4041_v51 }
 0x18e   : > { %3597 = vmatpush1.bf16.msra.mxu1 %v3596_v9  ;;  %v3639_v9 = vpack.c.bf16 %v3083_v8, %v3081_v6  ;;  %v1492_v6 = vld [vmem:[%s5530_s5 + $0x78] sm:$0xff] }
 0x18f   : > { %3598 = vmatprep.subr.bf16.mxu1 %v4041_v51 }
 0x192   : > { %3600 = vmatpush1.bf16.msra.mxu1 %v3599_v12  ;;  %v3085_v12 = vld [vmem:[%s5530_s5 + $0xd0] sm:$0xff] }
 0x193   : > { %3601 = vmatprep.subr.bf16.mxu1 %v4041_v51 }
 0x196   : > { %3603 = vmatpush1.bf16.msra.mxu1 %v3602_v18  ;;  %v3643_v18 = vpack.c.bf16 %v3087_v17, %v3085_v12  ;;  %v1494_v12 = vld [vmem:[%s5530_s5 + $0x88] sm:$0xff]  ;;  %v3671_v17 = vpack.c.bf16 %v1491_v11, %v1489_v10 }
 0x197   : > { %3604 = vmatprep.subr.bf16.mxu1 %v4041_v51 }
 0x19a   : > { %3606 = vmatpush1.bf16.msra.mxu1 %v3605_v21  ;;  %v3645_v21 = vpack.c.bf16 %v3092_v20, %v3090_v19  ;;  %v1493_v19 = vld [vmem:[%s5530_s5 + $0x80] sm:$0xff]  ;;  %v1495_v20 = vld [vmem:[%s5530_s5 + $0x90] sm:$0xff] }
 0x19b   : > { %1337 = vmatprep.subr.mxu1 %v4039_v7 }
 0x19e   : > { %1338 = vmatpush1.msra.mxu1 %v1289_v22  ;;  %v3089_v22 = vld [vmem:[%s5530_s5 + $0xf0] sm:$0xff] }
 0x19f   : > { %3607 = vmatprep.subr.bf16.mxu1 %v4041_v51  ;;  %v3647_v24 = vpack.c.bf16 %v3091_v23, %v3089_v22  ;;  %v1498_v22 = vld [vmem:[%s5530_s5 + $0xa8] sm:$0xf] }
 0x1a0   : > { %v3112_v23 = vld [vmem:[%s5530_s5 + $0x168] sm:$0xff] }
 0x247   : > { %v1168_v25 = vpop.f32.mrb[8].mxu0  ;;  %v1254_v26 = vpop.f32.mrb[0].mxu1 }
 0x248   : > { %v4694_v27 = vmax.f32 %v1168_v25, %v1254_v26  ;;  %v1170_v28 = vpop.f32.mrb[9].mxu0  ;;  %v1256_v29 = vpop.f32.mrb[1].mxu1  ;;  %v3094_v25 = vld [vmem:[%s5530_s5 + $0x118] sm:$0xff]  ;;  %v3096_v26 = vld [vmem:[%s5530_s5 + $0x128] sm:$0xff] }
 0x249   : > { %v1266_v30 = vmax.f32 %v1170_v28, %v1256_v29  ;;  %v3093_v28 = vld [vmem:[%s5530_s5 + $0x110] sm:$0xff]  ;;  %v3095_v29 = vld [vmem:[%s5530_s5 + $0x120] sm:$0xff] }
 0x24b   : > { %v1174_v34 = vpop.f32.mrb[10].mxu0  ;;  %v1260_v35 = vpop.f32.mrb[2].mxu1  ;;  %3056 = vmatprep.mubr.msk.f32.mxu1 %vm1290_vm5, %v1266_v30 }
 0x24c   : > { %v1267_v36 = vmax.f32 %v1174_v34, %v1260_v35  ;;  %v1176_v37 = vpop.f32.mrb[11].mxu0  ;;  %v1262_v38 = vpop.f32.mrb[3].mxu1  ;;  %1362 = vmatmul.mubr.f32.vlgmr.msra.gmra.mrb[4].mxu1 %v4694_v27  ;;  %v3097_v34 = vld [vmem:[%s5530_s5 + $0x130] sm:$0xff]  ;;  %v3099_v35 = vld [vmem:[%s5530_s5 + $0x140] sm:$0xff] }
 0x24d   : > { %v1268_v39 = vmax.f32 %v1176_v37, %v1262_v38  ;;  %3609 = vmatpush1.bf16.msra.mxu1 %v3608_v31  ;;  %v3098_v31 = vld [vmem:[%s5530_s5 + $0x138] sm:$0xff]  ;;  %v1478_v38 = vld [vmem:[%s5530_s5 + $0x8] sm:$0xff] }
 0x24e   : > { %3610 = vmatprep.subr.bf16.mxu1 %v4041_v51  ;;  %v3653_v33 = vpack.c.bf16 %v3100_v32, %v3098_v31  ;;  %v3102_v37 = vld [vmem:[%s5530_s5 + $0x158] sm:$0xf] }
 0x24f   : > { %3057 = vmatprep.mubr.msk.f32.mxu1 %vm1290_vm5, %v1268_v39 }
 0x250   : > { %1367 = vmatmul.mubr.f32.gmra.mrb[6].mxu1 %v1267_v36 }
 0x251   : > { %3612 = vmatpush1.bf16.msra.mxu1 %v3611_v40  ;;  %3079 = vmatprep.mubr.msk.f32.mxu1 %vm1290_vm5, %v1266_v30  ;;  %v3651_v30 = vpack.c.bf16 %v3095_v29, %v3093_v28  ;;  %v3101_v40 = vld [vmem:[%s5530_s5 + $0x150] sm:$0xf]  ;;  %v3118_v28 = vld [vmem:[%s5530_s5 + $0x198] sm:$0xff]  ;;  %v1497_v29 = vld [vmem:[%s5530_s5 + $0xa0] sm:$0xf] }
 0x252   : > { %3613 = vmatprep.subr.bf16.mxu1 %v4041_v51 }
 0x255   : > { %3615 = vmatpush1.bf16.msra.mxu1 %v3614_v43 }
 0x256   : > { %3616 = vmatprep.subr.bf16.mxu1 %v4041_v51 }
 0x259   : > { %3618 = vmatpush1.bf16.msra.mxu1 %v3617_v46 }
 0x25a   : > { %3619 = vmatprep.subr.bf16.mxu1 %v4041_v51 }
 0x25d   : > { %3621 = vmatpush1.bf16.msra.mxu1 %v3620_v49 }
 0x25e   : > { %3622 = vmatprep.subr.bf16.mxu1 %v4041_v51 }
 0x261   : > { %3624 = vmatpush1.bf16.msra.mxu1 %v3623_v53  ;;  %v1477_v53 = vld [vmem:[%s5530_s5] sm:$0xff] }
 0x262   : > { %3625 = vmatprep.subr.bf16.mxu1 %v4041_v51  ;;  %v3659_v57 = vpack.c.bf16 %v1479_v54, %v1477_v53  ;;  %v3127_v54 = vld [vmem:[%s5530_s5 + $0x1e0] sm:$0xff] }
 0x265   : > { %3627 = vmatpush1.bf16.msra.mxu1 %v3626_v56  ;;  %v1484_v56 = vld [vmem:[%s5530_s5 + $0x38] sm:$0xff] }
 0x266   : > { %3628 = vmatprep.subr.bf16.mxu1 %v4041_v51  ;;  %v3661_v58 = vpack.c.bf16 %v1484_v56, %v1482_v55  ;;  %v3129_v55 = vld [vmem:[%s5530_s5 + $0x1f0] sm:$0xff] }
 0x267   : > { %v3695_v56 = vpack.c.bf16 %v3129_v55, %v3127_v54  ;;  %v3178_v54 = vld [vmem:[%s5530_s5 + $0x338] sm:$0xff] }
 0x269   : > { %3630 = vmatpush1.bf16.msra.mxu1 %v3629_v59  ;;  %v1481_v59 = vld [vmem:[%s5530_s5 + $0x20] sm:$0xff] }
 0x26a   : > { %3631 = vmatprep.subr.bf16.mxu1 %v4041_v51  ;;  %v3663_v0 = vpack.c.bf16 %v1483_v60, %v1481_v59  ;;  %v3140_v59 = vld [vmem:[%s5530_s5 + $0x228] sm:$0xff]  ;;  %v3137_v60 = vld [vmem:[%s5530_s5 + $0x210] sm:$0xff] }
 0x26d   : > { %3633 = vmatpush1.bf16.msra.mxu1 %v3632_v62  ;;  %v1486_v62 = vld [vmem:[%s5530_s5 + $0x48] sm:$0xff] }
 0x26e   : > { %3634 = vmatprep.subr.bf16.mxu1 %v4041_v51 }
 0x271   : > { %3636 = vmatpush1.bf16.msra.mxu1 %v3635_v1  ;;  %v3665_v1 = vpack.c.bf16 %v1488_v63, %v1486_v62  ;;  %v3142_v62 = vld [vmem:[%s5530_s5 + $0x238] sm:$0xff]  ;;  %v3144_v63 = vld [vmem:[%s5530_s5 + $0x248] sm:$0xff] }
 0x272   : > { %1434 = vmatprep.subr.mxu1 %v4039_v7 }
 0x275   : > { %1435 = vmatpush1.msra.mxu1 %v3078_v2  ;;  %v1485_v2 = vld [vmem:[%s5530_s5 + $0x40] sm:$0xff] }
 0x276   : > { %1459 = vmatmul.mubr.f32.vlgmr.msra.gmra.mrb[8].mxu1 %v4694_v27  ;;  %3638 = vmatprep.subr.bf16.mxu1 %v3637_v5  ;;  %v3649_v27 = vpack.c.bf16 %v3096_v26, %v3094_v25  ;;  %v1490_v5 = vld [vmem:[%s5530_s5 + $0x68] sm:$0xff]  ;;  %v3667_v8 = vpack.c.bf16 %v1487_v3, %v1485_v2  ;;  %v3111_v25 = vld [vmem:[%s5530_s5 + $0x160] sm:$0xff]  ;;  %v3113_v26 = vld [vmem:[%s5530_s5 + $0x170] sm:$0xff]  ;;  %v3701_v3 = vpack.c.bf16 %v3144_v63, %v3142_v62 }
 0x277   : > { %3080 = vmatprep.mubr.msk.f32.mxu1 %vm1290_vm5, %v1268_v39  ;;  %3640 = vmatpush1.bf16.msra.mxu1 %v3639_v9  ;;  %v1480_v39 = vld [vmem:[%s5530_s5 + $0x18] sm:$0xff]  ;;  %v3669_v9 = vpack.c.bf16 %v1492_v6, %v1490_v5  ;;  %v3679_v31 = vpack.c.bf16 %v3113_v26, %v3111_v25  ;;  %v3143_v5 = vld [vmem:[%s5530_s5 + $0x240] sm:$0xff]  ;;  %v3156_v25 = vld [vmem:[%s5530_s5 + $0x2a8] sm:$0xff] }
 0x278   : > { %3642 = vmatprep.subr.bf16.mxu1 %v3641_v15  ;;  %v3657_v41 = vpack.c.bf16 %v1480_v39, %v1478_v38  ;;  %v1496_v15 = vld [vmem:[%s5530_s5 + $0x98] sm:$0xff]  ;;  %v3179_v63 = vld [vmem:[%s5530_s5 + $0x340] sm:$0xff] }
 0x27a   : > { %1464 = vmatmul.mubr.f32.gmra.mrb[10].mxu1 %v1267_v36  ;;  %v3655_v36 = vpack.c.bf16 %v3099_v35, %v3097_v34  ;;  %v3117_v34 = vld [vmem:[%s5530_s5 + $0x190] sm:$0xff] }
 0x27b   : > { %1600 = vmatprep.mubr.f32.mxu1 %v4039_v7  ;;  %3644 = vmatpush1.bf16.msra.mxu1 %v3643_v18  ;;  %v3673_v18 = vpack.c.bf16 %v1496_v15, %v1494_v12  ;;  %v3145_v12 = vld [vmem:[%s5530_s5 + $0x250] sm:$0xff]  ;;  %v3147_v15 = vld [vmem:[%s5530_s5 + $0x260] sm:$0xff] }
 0x27c   : > { %3646 = vmatprep.subr.bf16.mxu1 %v3645_v21  ;;  %v3675_v21 = vpack.c.bf16 %v1495_v20, %v1493_v19  ;;  %v3152_v19 = vld [vmem:[%s5530_s5 + $0x288] sm:$0xff]  ;;  %v3707_v20 = vpack.c.bf16 %v3147_v15, %v3145_v12 }
 0x27f   : > { %3648 = vmatpush1.bf16.msra.mxu1 %v3647_v24  ;;  %v3114_v24 = vld [vmem:[%s5530_s5 + $0x178] sm:$0xff] }
 0x280   : > { %3650 = vmatprep.subr.bf16.mxu1 %v3649_v27  ;;  %v3116_v27 = vld [vmem:[%s5530_s5 + $0x188] sm:$0xff] }
 0x281   : > { %v3681_v32 = vpack.c.bf16 %v3118_v28, %v3116_v27  ;;  %v3153_v28 = vld [vmem:[%s5530_s5 + $0x290] sm:$0xff] }
 0x283   : > { %3652 = vmatpush1.bf16.msra.mxu1 %v3651_v30  ;;  %v3677_v30 = vpack.c.bf16 %v3114_v24, %v3112_v23  ;;  %v3151_v23 = vld [vmem:[%s5530_s5 + $0x280] sm:$0xff]  ;;  %v3154_v24 = vld [vmem:[%s5530_s5 + $0x298] sm:$0xff] }
 0x284   : > { %3654 = vmatprep.subr.bf16.mxu1 %v3653_v33  ;;  %v3115_v33 = vld [vmem:[%s5530_s5 + $0x180] sm:$0xff]  ;;  %v3713_v27 = vpack.c.bf16 %v3156_v25, %v3154_v24 }
 0x285   : > { %v3683_v38 = vpack.c.bf16 %v3117_v34, %v3115_v33  ;;  %v3166_v33 = vld [vmem:[%s5530_s5 + $0x2d8] sm:$0xff]  ;;  %v3163_v34 = vld [vmem:[%s5530_s5 + $0x2c0] sm:$0xff] }
 0x287   : > { %3656 = vmatpush1.bf16.msra.mxu1 %v3655_v36  ;;  %v3120_v36 = vld [vmem:[%s5530_s5 + $0x1a8] sm:$0xff] }
 0x288   : > { %3103 = vmatprep.subr.msk.mxu1 %vm1095_vm1, %v3102_v37  ;;  %v3122_v37 = vld [vmem:[%s5530_s5 + $0x1b8] sm:$0xff] }
 0x289   : > { %v3685_v39 = vpack.c.bf16 %v3122_v37, %v3120_v36  ;;  %v3168_v36 = vld [vmem:[%s5530_s5 + $0x2e8] sm:$0xff]  ;;  %v3170_v37 = vld [vmem:[%s5530_s5 + $0x2f8] sm:$0xff] }
 0x28b   : > { %3104 = vmatpush1.msk.msra.mxu1 %vm1095_vm1, %v3101_v40  ;;  %v3119_v40 = vld [vmem:[%s5530_s5 + $0x1a0] sm:$0xff] }
 0x28c   : > { %3658 = vmatprep.subr.bf16.mxu1 %v3657_v41  ;;  %v3121_v41 = vld [vmem:[%s5530_s5 + $0x1b0] sm:$0xff] }
 0x31f   : > { %v1363_v42 = vpop.f32.mrb[4].mxu1 }
 0x320   : > { %v1365_v43 = vpop.f32.mrb[5].mxu1 }
 0x321   : > { %v3124_v43 = vld [vmem:[%s5530_s5 + $0x1c8] sm:$0xff] }
 0x323   : > { %v1368_v44 = vpop.f32.mrb[6].mxu1 }
 0x324   : > { %v1370_v45 = vpop.f32.mrb[7].mxu1 }
 0x325   : > { %v3687_v45 = vpack.c.bf16 %v3121_v41, %v3119_v40  ;;  %v3721_v41 = vpack.c.bf16 %v3170_v37, %v3168_v36  ;;  %v2244_v36 = vld [vmem:[%s5533_s8 + $0x38] sm:$0xff] }
 0x349   : > { %v1460_v46 = vpop.f32.mrb[8].mxu1 }
 0x34a   : > { %v1469_v47 = vmax.f32 %v1363_v42, %v1460_v46  ;;  %v1462_v48 = vpop.f32.mrb[9].mxu1 }
 0x34b   : > { %v3125_v48 = vld [vmem:[%s5530_s5 + $0x1d0] sm:$0xff] }
 0x34c   : > { %1472 = vst.msk [vmem:[#allocation2] sm:$0xff] %vm1471_vm6, %v1469_v47  ;;  %v3123_v47 = vld [vmem:[%s5530_s5 + $0x1c0] sm:$0xff] }
 0x34d   : > { %v1465_v49 = vpop.f32.mrb[10].mxu1 }
 0x34e   : > { %v1470_v50 = vmax.f32 %v1368_v44, %v1465_v49  ;;  %v1467_v52 = vpop.f32.mrb[11].mxu1  ;;  %v3126_v44 = vld [vmem:[%s5530_s5 + $0x1d8] sm:$0xff]  ;;  %v3128_v49 = vld [vmem:[%s5530_s5 + $0x1e8] sm:$0xff] }
 0x34f   : > { %v3689_v46 = vpack.c.bf16 %v3126_v44, %v3124_v43  ;;  %v3691_v52 = vpack.c.bf16 %v3125_v48, %v3123_v47  ;;  %v3169_v43 = vld [vmem:[%s5530_s5 + $0x2f0] sm:$0xff] }
 0x350   : > { %1474 = vst.msk [vmem:[#allocation2 + $0x8] sm:$0x3f] %vm1473_vm7, %v1470_v50  ;;  %v3130_v50 = vld [vmem:[%s5530_s5 + $0x1f8] sm:$0xff] }
 0x351   : > { %v3693_v53 = vpack.c.bf16 %v3130_v50, %v3128_v49  ;;  %v3171_v49 = vld [vmem:[%s5530_s5 + $0x300] sm:$0xff]  ;;  %v3173_v50 = vld [vmem:[%s5530_s5 + $0x310] sm:$0xff] }
 0x352   : > { %v3727_v55 = vpack.c.bf16 %v3173_v50, %v3171_v49  ;;  %v2253_v50 = vld [vmem:[%s5533_s8 + $0x80] sm:$0xff] }
 0x353   : > { %v1475_v35 = vld [vmem:[#allocation2] sm:$0xff] }
 0x357   : > { %v1499_v61 = vld [vmem:[#allocation2 + $0x1] sm:$0xff]  ;;  %v1500_v4 = vld [vmem:[#allocation2 + $0x9] sm:$0x3] }
 0x358   : > { %3105 = vmatmul.mubr.msk.f32.vlgmr.msra.gmra.mrb[12].mxu1 %vm1471_vm6, %v1499_v61  ;;  %v1476_v42 = vld [vmem:[#allocation2 + $0x8] sm:$0x3]  ;;  %v3139_v61 = vld [vmem:[%s5530_s5 + $0x220] sm:$0xff] }
 0x359   : > { %3660 = vmatpush1.bf16.msra.mxu1 %v3659_v57  ;;  %1606 = vmatprep.mubr.f32.mxu1 %v4039_v7  ;;  %v3132_v57 = vld [vmem:[%s5530_s5 + $0x208] sm:$0xf]  ;;  %v3699_v2 = vpack.c.bf16 %v3139_v61, %v3137_v60  ;;  %v3182_v60 = vld [vmem:[%s5530_s5 + $0x358] sm:$0xff] }
 0x35a   : > { %3662 = vmatprep.subr.bf16.mxu1 %v3661_v58  ;;  %v3138_v58 = vld [vmem:[%s5530_s5 + $0x218] sm:$0xff]  ;;  %v1702_v6 = vld [vmem:[#allocation2 + $0x2] sm:$0xff] }
 0x35b   : > { %v1820_v44 = vld [vmem:[#allocation2 + $0x3] sm:$0xff] }
 0x35c   : > { %3106 = vmatmul.mubr.msk.f32.gmra.mrb[14].mxu1 %vm1471_vm6, %v1500_v4  ;;  %v3141_v4 = vld [vmem:[%s5530_s5 + $0x230] sm:$0xff] }
 0x35d   : > { %3664 = vmatpush1.bf16.msra.mxu1 %v3663_v0  ;;  %1689 = vmatprep.mubr.f32.mxu1 %v4039_v7  ;;  %v3131_v0 = vld [vmem:[%s5530_s5 + $0x200] sm:$0xf]  ;;  %v3703_v10 = vpack.c.bf16 %v3143_v5, %v3141_v4  ;;  %v1938_v4 = vld [vmem:[#allocation2 + $0x4] sm:$0xff]  ;;  %v1939_v5 = vld [vmem:[#allocation2 + $0xc] sm:$0x3] }
 0x35e   : > { %3666 = vmatprep.subr.bf16.mxu1 %v3665_v1  ;;  %v3697_v1 = vpack.c.bf16 %v3140_v59, %v3138_v58  ;;  %v3177_v58 = vld [vmem:[%s5530_s5 + $0x330] sm:$0xff]  ;;  %v3180_v59 = vld [vmem:[%s5530_s5 + $0x348] sm:$0xff] }
 0x35f   : > { %v3733_v62 = vpack.c.bf16 %v3182_v60, %v3180_v59  ;;  %v3197_v59 = vld [vmem:[%s5533_s8 + $0xa0] sm:$0xff]  ;;  %v3198_v60 = vld [vmem:[%s5533_s8 + $0xa8] sm:$0xff] }
 0x361   : > { %3668 = vmatpush1.bf16.msra.mxu1 %v3667_v8  ;;  %v3146_v8 = vld [vmem:[%s5530_s5 + $0x258] sm:$0xff] }
 0x362   : > { %3670 = vmatprep.subr.bf16.mxu1 %v3669_v9  ;;  %v3148_v9 = vld [vmem:[%s5530_s5 + $0x268] sm:$0xff] }
 0x363   : > { %v3705_v11 = vpack.c.bf16 %v3148_v9, %v3146_v8 }
 0x365   : > { %3672 = vmatpush1.bf16.msra.mxu1 %v3671_v17  ;;  %v1703_v17 = vld [vmem:[#allocation2 + $0xa] sm:$0x3] }
 0x366   : > { %3674 = vmatprep.subr.bf16.mxu1 %v3673_v18  ;;  %v3150_v18 = vld [vmem:[%s5530_s5 + $0x278] sm:$0xff] }
 0x369   : > { %3676 = vmatpush1.bf16.msra.mxu1 %v3675_v21  ;;  %v3709_v21 = vpack.c.bf16 %v3152_v19, %v3150_v18 }
 0x36a   : > { %3107 = vmatprep.subr.msk.mxu1 %vm1095_vm1, %v1498_v22  ;;  %v3149_v22 = vld [vmem:[%s5530_s5 + $0x270] sm:$0xff] }
 0x36b   : > { %v3711_v26 = vpack.c.bf16 %v3151_v23, %v3149_v22 }
 0x36d   : > { %3108 = vmatpush1.msk.msra.mxu1 %vm1095_vm1, %v1497_v29  ;;  %v3155_v29 = vld [vmem:[%s5530_s5 + $0x2a0] sm:$0xff] }
 0x36e   : > { %3109 = vmatmul.mubr.msk.f32.vlgmr.msra.gmra.mrb[12].mxu1 %vm1471_vm6, %v1475_v35  ;;  %3678 = vmatprep.subr.bf16.mxu1 %v3677_v30  ;;  %v3715_v30 = vpack.c.bf16 %v3155_v29, %v3153_v28  ;;  %v3165_v35 = vld [vmem:[%s5530_s5 + $0x2d0] sm:$0xff] }
 0x36f   : > { %3680 = vmatpush1.bf16.msra.mxu1 %v3679_v31  ;;  %1695 = vmatprep.mubr.f32.mxu1 %v4039_v7  ;;  %v3158_v31 = vld [vmem:[%s5530_s5 + $0x2b8] sm:$0xf]  ;;  %v3719_v40 = vpack.c.bf16 %v3165_v35, %v3163_v34  ;;  %v2239_v29 = vld [vmem:[%s5533_s8 + $0x10] sm:$0xff] }
 0x370   : > { %3682 = vmatprep.subr.bf16.mxu1 %v3681_v32  ;;  %v3164_v32 = vld [vmem:[%s5530_s5 + $0x2c8] sm:$0xff]  ;;  %v2243_v35 = vld [vmem:[%s5533_s8 + $0x30] sm:$0xff] }
 0x371   : > { %v3759_v37 = vpack.c.bf16 %v2244_v36, %v2243_v35  ;;  %v3220_v35 = vld [vmem:[%s5534_s9 + $0x60] sm:$0xff]  ;;  %v3221_v36 = vld [vmem:[%s5534_s9 + $0x68] sm:$0xff] }
 0x372   : > { %3110 = vmatmul.mubr.msk.f32.gmra.mrb[14].mxu1 %vm1471_vm6, %v1476_v42  ;;  %v3167_v42 = vld [vmem:[%s5530_s5 + $0x2e0] sm:$0xff] }
 0x373   : > { %3684 = vmatpush1.bf16.msra.mxu1 %v3683_v38  ;;  %1803 = vmatprep.mubr.f32.mxu1 %v4039_v7  ;;  %v3157_v38 = vld [vmem:[%s5530_s5 + $0x2b0] sm:$0xf]  ;;  %v3723_v47 = vpack.c.bf16 %v3169_v43, %v3167_v42  ;;  %v2248_v42 = vld [vmem:[%s5533_s8 + $0x58] sm:$0xff] }
 0x374   : > { %3686 = vmatprep.subr.bf16.mxu1 %v3685_v39  ;;  %v3717_v39 = vpack.c.bf16 %v3166_v33, %v3164_v32  ;;  %v2241_v32 = vld [vmem:[%s5533_s8 + $0x20] sm:$0xff]  ;;  %v2242_v33 = vld [vmem:[%s5533_s8 + $0x28] sm:$0xff] }
 0x375   : > { %v3756_v34 = vpack.c.bf16 %v2242_v33, %v2241_v32  ;;  %v2426_v32 = vld [vmem:[%s5534_s9] sm:$0xff] }
 0x377   : > { %3688 = vmatpush1.bf16.msra.mxu1 %v3687_v45  ;;  %v3172_v45 = vld [vmem:[%s5530_s5 + $0x308] sm:$0xff] }
 0x378   : > { %3690 = vmatprep.subr.bf16.mxu1 %v3689_v46  ;;  %v3174_v46 = vld [vmem:[%s5530_s5 + $0x318] sm:$0xff] }
 0x379   : > { %v3725_v48 = vpack.c.bf16 %v3174_v46, %v3172_v45  ;;  %v2250_v45 = vld [vmem:[%s5533_s8 + $0x68] sm:$0xff] }
 0x37b   : > { %3692 = vmatpush1.bf16.msra.mxu1 %v3691_v52  ;;  %v1821_v52 = vld [vmem:[#allocation2 + $0xb] sm:$0x3] }
 0x37c   : > { %3694 = vmatprep.subr.bf16.mxu1 %v3693_v53  ;;  %v3176_v53 = vld [vmem:[%s5530_s5 + $0x328] sm:$0xff] }
 0x37f   : > { %3696 = vmatpush1.bf16.msra.mxu1 %v3695_v56  ;;  %v3729_v56 = vpack.c.bf16 %v3178_v54, %v3176_v53  ;;  %v2255_v54 = vld [vmem:[%s5533_s8 + $0x90] sm:$0xff] }
 0x380   : > { %3133 = vmatprep.subr.msk.mxu1 %vm1095_vm1, %v3132_v57  ;;  %v3175_v57 = vld [vmem:[%s5530_s5 + $0x320] sm:$0xff] }
 0x381   : > { %v3731_v61 = vpack.c.bf16 %v3177_v58, %v3175_v57 }
 0x383   : > { %3134 = vmatpush1.msk.msra.mxu1 %vm1095_vm1, %v3131_v0  ;;  %v3181_v0 = vld [vmem:[%s5530_s5 + $0x350] sm:$0xff] }
 0x384   : > { %3135 = vmatmul.mubr.msk.f32.vlgmr.msra.gmra.mrb[12].mxu1 %vm1471_vm6, %v1702_v6  ;;  %3698 = vmatprep.subr.bf16.mxu1 %v3697_v1  ;;  %v3735_v1 = vpack.c.bf16 %v3181_v0, %v3179_v63  ;;  %v2056_v6 = vld [vmem:[%s5531_s6] sm:$0x3] }
 0x385   : > { %3700 = vmatpush1.bf16.msra.mxu1 %v3699_v2  ;;  %1809 = vmatprep.mubr.f32.mxu1 %v4039_v7  ;;  %v3184_v2 = vld [vmem:[%s5530_s5 + $0x368] sm:$0xf]  ;;  %v2061_v8 = vrot.slane %v2056_v6, %v1062_v14 }
 0x386   : > { %3702 = vmatprep.subr.bf16.mxu1 %v3701_v3  ;;  %v3183_v3 = vld [vmem:[%s5530_s5 + $0x360] sm:$0xf] }
 0x388   : > { %3136 = vmatmul.mubr.msk.f32.gmra.mrb[14].mxu1 %vm1471_vm6, %v1703_v17 }
 0x389   : > { %3704 = vmatpush1.bf16.msra.mxu1 %v3703_v10  ;;  %1921 = vmatprep.mubr.f32.mxu1 %v4039_v7  ;;  %v2065_v10 = vrot.slane %v2056_v6, %v1066_v16  ;;  %v2237_v16 = vld [vmem:[%s5533_s8] sm:$0xff]  ;;  %v3202_v6 = vld [vmem:[%s5533_s8 + $0xc8] sm:$0xff] }
 0x38a   : > { %3706 = vmatprep.subr.bf16.mxu1 %v3705_v11 }
 0x38d   : > { %3708 = vmatpush1.bf16.msra.mxu1 %v3707_v20 }
 0x38e   : > { %3710 = vmatprep.subr.bf16.mxu1 %v3709_v21 }
 0x391   : > { %3712 = vmatpush1.bf16.msra.mxu1 %v3711_v26  ;;  %v2238_v26 = vld [vmem:[%s5533_s8 + $0x8] sm:$0xff] }
 0x392   : > { %3714 = vmatprep.subr.bf16.mxu1 %v3713_v27  ;;  %v3192_v27 = vld [vmem:[%s5532_s7 + $0x8] sm:$0x1f]  ;;  %v3750_v28 = vpack.c.bf16 %v2238_v26, %v2237_v16 }
 0x393   : > { %v3214_v16 = vld [vmem:[%s5533_s8 + $0x128] sm:$0xff] }
 0x395   : > { %3716 = vmatpush1.bf16.msra.mxu1 %v3715_v30  ;;  %v2240_v30 = vld [vmem:[%s5533_s8 + $0x18] sm:$0xff] }
 0x396   : > { %3159 = vmatprep.subr.msk.mxu1 %vm1095_vm1, %v3158_v31  ;;  %v3753_v31 = vpack.c.bf16 %v2240_v30, %v2239_v29  ;;  %v3218_v30 = vld [vmem:[%s5534_s9 + $0x50] sm:$0xff] }
 0x399   : > { %3160 = vmatpush1.msk.msra.mxu1 %vm1095_vm1, %v3157_v38  ;;  %v2245_v38 = vld [vmem:[%s5533_s8 + $0x40] sm:$0xff] }
 0x39a   : > { %3161 = vmatmul.mubr.msk.f32.vlgmr.msra.gmra.mrb[12].mxu1 %vm1471_vm6, %v1820_v44  ;;  %3718 = vmatprep.subr.bf16.mxu1 %v3717_v39  ;;  %v2246_v39 = vld [vmem:[%s5533_s8 + $0x48] sm:$0xff]  ;;  %v2249_v44 = vld [vmem:[%s5533_s8 + $0x60] sm:$0xff] }
 0x39b   : > { %3720 = vmatpush1.bf16.msra.mxu1 %v3719_v40  ;;  %1927 = vmatprep.mubr.f32.mxu1 %v4039_v7  ;;  %v3762_v40 = vpack.c.bf16 %v2246_v39, %v2245_v38  ;;  %v3768_v46 = vpack.c.bf16 %v2250_v45, %v2249_v44  ;;  %v2428_v38 = vld [vmem:[%s5534_s9 + $0x10] sm:$0xff]  ;;  %v2429_v39 = vld [vmem:[%s5534_s9 + $0x18] sm:$0xff]  ;;  %v2430_v44 = vld [vmem:[%s5534_s9 + $0x20] sm:$0xff] }
 0x39c   : > { %3722 = vmatprep.subr.bf16.mxu1 %v3721_v41  ;;  %v2247_v41 = vld [vmem:[%s5533_s8 + $0x50] sm:$0xff]  ;;  %v2431_v45 = vld [vmem:[%s5534_s9 + $0x28] sm:$0xff] }
 0x39d   : > { %v3765_v43 = vpack.c.bf16 %v2248_v42, %v2247_v41  ;;  %v3828_v41 = vpack.c.bf16 %v2429_v39, %v2428_v38  ;;  %v3222_v42 = vld [vmem:[%s5534_s9 + $0x70] sm:$0xff]  ;;  %v3255_v39 = vld [vmem:[%s5534_s9 + $0x158] sm:$0xff] }
 0x39e   : > { %3162 = vmatmul.mubr.msk.f32.gmra.mrb[14].mxu1 %vm1471_vm6, %v1821_v52  ;;  %v2254_v52 = vld [vmem:[%s5533_s8 + $0x88] sm:$0xff]  ;;  %v3254_v38 = vld [vmem:[%s5534_s9 + $0x150] sm:$0xff] }
 0x39f   : > { %3724 = vmatpush1.bf16.msra.mxu1 %v3723_v47  ;;  %2039 = vmatprep.mubr.f32.mxu1 %v4039_v7  ;;  %v2251_v47 = vld [vmem:[%s5533_s8 + $0x70] sm:$0xff]  ;;  %v3774_v53 = vpack.c.bf16 %v2254_v52, %v2253_v50 }
 0x3a0   : > { %3726 = vmatprep.subr.bf16.mxu1 %v3725_v48  ;;  %v2252_v48 = vld [vmem:[%s5533_s8 + $0x78] sm:$0xff]  ;;  %v2432_v50 = vld [vmem:[%s5534_s9 + $0x30] sm:$0xff] }
 0x3a1   : > { %v3771_v49 = vpack.c.bf16 %v2252_v48, %v2251_v47  ;;  %v3831_v47 = vpack.c.bf16 %v2431_v45, %v2430_v44  ;;  %v3224_v48 = vld [vmem:[%s5534_s9 + $0x80] sm:$0xff]  ;;  %v3257_v44 = vld [vmem:[%s5534_s9 + $0x168] sm:$0xff] }
 0x3a3   : > { %3728 = vmatpush1.bf16.msra.mxu1 %v3727_v55  ;;  %v2256_v55 = vld [vmem:[%s5533_s8 + $0x98] sm:$0xff] }
 0x3a4   : > { %3730 = vmatprep.subr.bf16.mxu1 %v3729_v56  ;;  %v3777_v56 = vpack.c.bf16 %v2256_v55, %v2255_v54  ;;  %v3226_v55 = vld [vmem:[%s5534_s9 + $0x90] sm:$0xff] }
 0x3a7   : > { %3732 = vmatpush1.bf16.msra.mxu1 %v3731_v61 }
 0x3a8   : > { %3734 = vmatprep.subr.bf16.mxu1 %v3733_v62 }
 0x3ab   : > { %3736 = vmatpush1.bf16.msra.mxu1 %v3735_v1  ;;  %v3780_v1 = vpack.c.bf16 %v3198_v60, %v3197_v59  ;;  %v2435_v59 = vld [vmem:[%s5534_s9 + $0x48] sm:$0xff] }
 0x3ac   : > { %3185 = vmatprep.subr.msk.mxu1 %vm1095_vm1, %v3184_v2  ;;  %v3199_v2 = vld [vmem:[%s5533_s8 + $0xb0] sm:$0xff] }
 0x3af   : > { %3186 = vmatpush1.msk.msra.mxu1 %vm1095_vm1, %v3183_v3  ;;  %v3200_v3 = vld [vmem:[%s5533_s8 + $0xb8] sm:$0xff] }
 0x3b0   : > { %3187 = vmatmul.mubr.msk.f32.vlgmr.msra.gmra.mrb[12].mxu1 %vm1471_vm6, %v1938_v4  ;;  %3809 = vmatprep.subr.bf16.mxu1 %v4041_v51  ;;  %v3783_v4 = vpack.c.bf16 %v3200_v3, %v3199_v2  ;;  %v3230_v2 = vld [vmem:[%s5534_s9 + $0xa0] sm:$0xff]  ;;  %v3231_v3 = vld [vmem:[%s5534_s9 + $0xa8] sm:$0xff] }
 0x3b1   : > { %2045 = vmatprep.mubr.f32.mxu1 %v4039_v7 }
 0x3b4   : > { %3188 = vmatmul.mubr.msk.f32.gmra.mrb[14].mxu1 %vm1471_vm6, %v1939_v5  ;;  %v3201_v5 = vld [vmem:[%s5533_s8 + $0xc0] sm:$0xff] }
 0x3b5   : > { %3342 = vmatprep.mubr.msk.f32.mxu1 %vm4042_vm12, %v4039_v7 }
 0x483   : > { %v2041_v9 = vpop.f32.mrb[12].mxu1 }
 0x484   : > { %v2043_v11 = vpop.f32.mrb[13].mxu1  ;;  %v2068_v12 = vadd.f32 %v2061_v8, %v2041_v9  ;;  %v3203_v9 = vld [vmem:[%s5533_s8 + $0xd0] sm:$0xff] }
 0x485   : > { %v2069_v15 = vadd.f32 %v2065_v10, %v2043_v11 }
 0x486   : > { %v2072_v21 = vmax.f32 %v2068_v12, 0.0  ;;  %v3205_v12 = vld [vmem:[%s5533_s8 + $0xe0] sm:$0xff] }
 0x487   : > { %v2047_v17 = vpop.f32.mrb[14].mxu1  ;;  %v2073_v23 = vmax.f32 %v2069_v15, 0.0  ;;  %v3206_v15 = vld [vmem:[%s5533_s8 + $0xe8] sm:$0xff] }
 0x488   : > { %v2070_v18 = vadd.f32 %v2061_v8, %v2047_v17  ;;  %v2049_v19 = vpop.f32.mrb[15].mxu1  ;;  %v3786_v8 = vpack.c.bf16 %v3202_v6, %v3201_v5  ;;  %v3792_v17 = vpack.c.bf16 %v3206_v15, %v3205_v12  ;;  %v3242_v5 = vld [vmem:[%s5534_s9 + $0xf8] sm:$0xff]  ;;  %v3840_v6 = vpack.c.bf16 %v3231_v3, %v3230_v2  ;;  %v3244_v12 = vld [vmem:[%s5534_s9 + $0x108] sm:$0xff] }
 0x489   : > { %v2071_v20 = vadd.f32 %v2065_v10, %v2049_v19  ;;  %v3204_v10 = vld [vmem:[%s5533_s8 + $0xd8] sm:$0xff] }
 0x48a   : > { %v2074_v22 = vmax.f32 %v2070_v18, 0.0  ;;  %v3789_v11 = vpack.c.bf16 %v3204_v10, %v3203_v9  ;;  %v3207_v18 = vld [vmem:[%s5533_s8 + $0xf0] sm:$0xff]  ;;  %v3208_v19 = vld [vmem:[%s5533_s8 + $0xf8] sm:$0xff] }
 0x48b   : > { %v2075_v24 = vmax.f32 %v2071_v20, 0.0  ;;  %v3795_v20 = vpack.c.bf16 %v3208_v19, %v3207_v18  ;;  %v3232_v9 = vld [vmem:[%s5534_s9 + $0xb0] sm:$0xff]  ;;  %v3233_v10 = vld [vmem:[%s5534_s9 + $0xb8] sm:$0xff] }
 0x48c   : > { %v3740_v25 = vpack.c.bf16 %v2074_v22, %v2072_v21  ;;  %v3209_v21 = vld [vmem:[%s5533_s8 + $0x100] sm:$0xff]  ;;  %v3210_v22 = vld [vmem:[%s5533_s8 + $0x108] sm:$0xff]  ;;  %v3843_v18 = vpack.c.bf16 %v3233_v10, %v3232_v9 }
 0x48d   : > { %v3737_v14 = vpack.c.bf16 %v2075_v24, %v2073_v23  ;;  %v3798_v23 = vpack.c.bf16 %v3210_v22, %v3209_v21  ;;  %v3211_v24 = vld [vmem:[%s5533_s8 + $0x110] sm:$0xff]  ;;  %v3235_v21 = vld [vmem:[%s5534_s9 + $0xc8] sm:$0xff] }
 0x48e   : > { %v3245_v22 = vld [vmem:[%s5534_s9 + $0x110] sm:$0xff] }
 0x48f   : > { %3739 = vmatprep.subr.msk.bf16.mxu0 %vm3738_vm9, %v3737_v14 }
 0x490   : > { %3742 = vmatpush1.bf16.msk.msra.mxu0 %vm3738_vm9, %v3740_v25 }
 0x491   : > { %3745 = vmatprep.subr.msk.bf16.mxu0 %vm3738_vm9, %v3737_v14 }
 0x493   : > { %3191 = vmatmul.mubr.msk.f32.vlgmr.msra.gmra.mrb[12].mxu0 %vm2077_vm10, %v2076_v13  ;;  %v3213_v13 = vld [vmem:[%s5533_s8 + $0x120] sm:$0xff] }
 0x494   : > { %3748 = vmatpush1.bf16.msk.msra.mxu0 %vm3738_vm9, %v3740_v25  ;;  %2228 = vmatprep.mubr.f32.mxu0 %v4039_v7  ;;  %v3212_v25 = vld [vmem:[%s5533_s8 + $0x118] sm:$0xff]  ;;  %v3804_v26 = vpack.c.bf16 %v3214_v16, %v3213_v13  ;;  %v3247_v16 = vld [vmem:[%s5534_s9 + $0x120] sm:$0xff] }
 0x495   : > { %3749 = vmatprep.subr.bf16.mxu0 %v4041_v51  ;;  %v3801_v14 = vpack.c.bf16 %v3212_v25, %v3211_v24  ;;  %v3237_v13 = vld [vmem:[%s5534_s9 + $0xd8] sm:$0xff] }
 0x497   : > { %3195 = vmatmul.mubr.msk.f32.vlgmr.msra.gmra.mrb[14].mxu0 %vm2077_vm10, %v3192_v27  ;;  %v3215_v27 = vld [vmem:[%s5533_s8 + $0x130] sm:$0xff] }
 0x498   : > { %3751 = vmatpush1.bf16.msra.mxu0 %v3750_v28  ;;  %v3216_v28 = vld [vmem:[%s5533_s8 + $0x138] sm:$0xff] }
 0x499   : > { %3752 = vmatprep.subr.bf16.mxu0 %v4041_v51  ;;  %v3807_v29 = vpack.c.bf16 %v3216_v28, %v3215_v27 }
 0x49c   : > { %3754 = vmatpush1.bf16.msra.mxu0 %v3753_v31  ;;  %v3219_v31 = vld [vmem:[%s5534_s9 + $0x58] sm:$0xff] }
 0x49d   : > { %3755 = vmatprep.subr.bf16.mxu0 %v4041_v51  ;;  %v3810_v33 = vpack.c.bf16 %v3219_v31, %v3218_v30  ;;  %v3239_v30 = vld [vmem:[%s5534_s9 + $0xe8] sm:$0xff]  ;;  %v3249_v31 = vld [vmem:[%s5534_s9 + $0x130] sm:$0xff] }
 0x49f   : > { %3811 = vmatpush3.bf16.msra.mxu1 %v3810_v33 }
 0x4a0   : > { %3757 = vmatpush1.bf16.msra.mxu0 %v3756_v34  ;;  %v2427_v34 = vld [vmem:[%s5534_s9 + $0x8] sm:$0xff]  ;;  %3812 = vmatprep.subr.bf16.mxu1 %v4041_v51 }
 0x4a1   : > { %3758 = vmatprep.subr.bf16.mxu0 %v4041_v51 }
 0x4a4   : > { %3760 = vmatpush1.bf16.msra.mxu0 %v3759_v37  ;;  %v3825_v37 = vpack.c.bf16 %v2427_v34, %v2426_v32  ;;  %v3250_v32 = vld [vmem:[%s5534_s9 + $0x138] sm:$0xff] }
 0x4a5   : > { %3761 = vmatprep.subr.bf16.mxu0 %v4041_v51  ;;  %v3867_v34 = vpack.c.bf16 %v3250_v32, %v3249_v31 }
 0x4a8   : > { %3763 = vmatpush1.bf16.msra.mxu0 %v3762_v40  ;;  %v3813_v40 = vpack.c.bf16 %v3221_v36, %v3220_v35  ;;  %v3252_v35 = vld [vmem:[%s5534_s9 + $0x140] sm:$0xff]  ;;  %v3253_v36 = vld [vmem:[%s5534_s9 + $0x148] sm:$0xff] }
 0x4a9   : > { %3764 = vmatprep.subr.bf16.mxu0 %v4041_v51 }
 0x4aa   : > { %3814 = vmatpush3.bf16.msra.mxu1 %v3813_v40 }
 0x4ab   : > { %3815 = vmatprep.subr.bf16.mxu1 %v4041_v51 }
 0x4ac   : > { %3766 = vmatpush1.bf16.msra.mxu0 %v3765_v43  ;;  %v3223_v43 = vld [vmem:[%s5534_s9 + $0x78] sm:$0xff] }
 0x4ad   : > { %3767 = vmatprep.subr.bf16.mxu0 %v4041_v51 }
 0x4b0   : > { %3769 = vmatpush1.bf16.msra.mxu0 %v3768_v46  ;;  %v3816_v46 = vpack.c.bf16 %v3223_v43, %v3222_v42  ;;  %v3873_v42 = vpack.c.bf16 %v3255_v39, %v3254_v38  ;;  %v3256_v43 = vld [vmem:[%s5534_s9 + $0x160] sm:$0xff] }
 0x4b1   : > { %3770 = vmatprep.subr.bf16.mxu0 %v4041_v51  ;;  %v3876_v45 = vpack.c.bf16 %v3257_v44, %v3256_v43 }
 0x4b2   : > { %3817 = vmatpush3.bf16.msra.mxu1 %v3816_v46  ;;  %v3258_v46 = vld [vmem:[%s5534_s9 + $0x170] sm:$0xff] }
 0x4b3   : > { %3818 = vmatprep.subr.bf16.mxu1 %v4041_v51 }
 0x4b4   : > { %3772 = vmatpush1.bf16.msra.mxu0 %v3771_v49  ;;  %v3225_v49 = vld [vmem:[%s5534_s9 + $0x88] sm:$0xff] }
 0x4b5   : > { %3773 = vmatprep.subr.bf16.mxu0 %v4041_v51  ;;  %v3819_v52 = vpack.c.bf16 %v3225_v49, %v3224_v48  ;;  %v3260_v48 = vld [vmem:[%s5534_s9 + $0x180] sm:$0xff]  ;;  %v3261_v49 = vld [vmem:[%s5534_s9 + $0x188] sm:$0xff] }
 0x4b7   : > { %3820 = vmatpush3.bf16.msra.mxu1 %v3819_v52 }
 0x4b8   : > { %3775 = vmatpush1.bf16.msra.mxu0 %v3774_v53  ;;  %v2433_v53 = vld [vmem:[%s5534_s9 + $0x38] sm:$0xff]  ;;  %3821 = vmatprep.subr.bf16.mxu1 %v4041_v51 }
 0x4b9   : > { %3776 = vmatprep.subr.bf16.mxu0 %v4041_v51  ;;  %v3834_v54 = vpack.c.bf16 %v2433_v53, %v2432_v50  ;;  %v3882_v50 = vpack.c.bf16 %v3261_v49, %v3260_v48 }
 0x4bc   : > { %3778 = vmatpush1.bf16.msra.mxu0 %v3777_v56  ;;  %v3227_v56 = vld [vmem:[%s5534_s9 + $0x98] sm:$0xff] }
 0x4bd   : > { %3779 = vmatprep.subr.bf16.mxu0 %v4041_v51 }
 0x566   : > { %v2154_v57 = vpop.f32.mrb[12].mxu0 }
 0x567   : > { %v2156_v58 = vpop.f32.mrb[13].mxu0 }
 0x56a   : > { %v2230_v61 = vpop.f32.mrb[14].mxu0 }
 0x56b   : > { %v2235_v62 = vmax.f32 %v2154_v57, %v2230_v61  ;;  %v2232_v63 = vpop.f32.mrb[15].mxu0  ;;  %v2434_v57 = vld [vmem:[%s5534_s9 + $0x40] sm:$0xff] }
 0x56c   : > { %v2236_v0 = vmax.f32 %v2156_v58, %v2232_v63  ;;  %v3822_v58 = vpack.c.bf16 %v3227_v56, %v3226_v55  ;;  %v3837_v60 = vpack.c.bf16 %v2435_v59, %v2434_v57 }
 0x56e   : > { %3196 = vmatprep.mubr.msk.f32.mxu0 %vm2257_vm11, %v2236_v0  ;;  %3823 = vmatpush3.bf16.msra.mxu1 %v3822_v58 }
 0x56f   : > { %2326 = vmatmul.mubr.f32.vlgmr.msra.gmra.mrb[16].mxu0 %v2235_v62  ;;  %3839 = vmatprep.subr.bf16.mxu1 %v4041_v51 }
 0x570   : > { %3781 = vmatpush1.bf16.msra.mxu0 %v3780_v1  ;;  %3217 = vmatprep.mubr.msk.f32.mxu0 %vm2257_vm11, %v2236_v0 }
 0x571   : > { %3782 = vmatprep.subr.bf16.mxu0 %v4041_v51 }
 0x574   : > { %3784 = vmatpush1.bf16.msra.mxu0 %v3783_v4  ;;  %v3241_v4 = vld [vmem:[%s5534_s9 + $0xf0] sm:$0xff] }
 0x575   : > { %3785 = vmatprep.subr.bf16.mxu0 %v4041_v51 }
 0x578   : > { %3787 = vmatpush1.bf16.msra.mxu0 %v3786_v8  ;;  %v3855_v8 = vpack.c.bf16 %v3242_v5, %v3241_v4 }
 0x579   : > { %3788 = vmatprep.subr.bf16.mxu0 %v4041_v51 }
 0x57c   : > { %3790 = vmatpush1.bf16.msra.mxu0 %v3789_v11  ;;  %v3243_v11 = vld [vmem:[%s5534_s9 + $0x100] sm:$0xff] }
 0x57d   : > { %3791 = vmatprep.subr.bf16.mxu0 %v4041_v51  ;;  %v3858_v19 = vpack.c.bf16 %v3244_v12, %v3243_v11 }
 0x580   : > { %3793 = vmatpush1.bf16.msra.mxu0 %v3792_v17 }
 0x581   : > { %3794 = vmatprep.subr.bf16.mxu0 %v4041_v51 }
 0x584   : > { %3796 = vmatpush1.bf16.msra.mxu0 %v3795_v20  ;;  %v3234_v20 = vld [vmem:[%s5534_s9 + $0xc0] sm:$0xff] }
 0x585   : > { %3797 = vmatprep.subr.bf16.mxu0 %v4041_v51  ;;  %v3846_v24 = vpack.c.bf16 %v3235_v21, %v3234_v20 }
 0x588   : > { %3799 = vmatpush1.bf16.msra.mxu0 %v3798_v23  ;;  %v3246_v23 = vld [vmem:[%s5534_s9 + $0x118] sm:$0xff] }
 0x589   : > { %3800 = vmatprep.subr.bf16.mxu0 %v4041_v51  ;;  %v3861_v25 = vpack.c.bf16 %v3246_v23, %v3245_v22 }
 0x58c   : > { %3802 = vmatpush1.bf16.msra.mxu0 %v3801_v14  ;;  %v3236_v14 = vld [vmem:[%s5534_s9 + $0xd0] sm:$0xff] }
 0x58d   : > { %3803 = vmatprep.subr.bf16.mxu0 %v4041_v51  ;;  %v3849_v27 = vpack.c.bf16 %v3237_v13, %v3236_v14 }
 0x590   : > { %3805 = vmatpush1.bf16.msra.mxu0 %v3804_v26  ;;  %v3248_v26 = vld [vmem:[%s5534_s9 + $0x128] sm:$0xff] }
 0x591   : > { %3806 = vmatprep.subr.bf16.mxu0 %v4041_v51  ;;  %v3864_v28 = vpack.c.bf16 %v3248_v26, %v3247_v16 }
 0x594   : > { %3808 = vmatpush1.bf16.msra.mxu0 %v3807_v29  ;;  %v3238_v29 = vld [vmem:[%s5534_s9 + $0xe0] sm:$0xff] }
 0x595   : > { %3824 = vmatprep.subr.bf16.mxu0 %v4041_v51  ;;  %v3852_v33 = vpack.c.bf16 %v3239_v30, %v3238_v29 }
 0x597   : > { %2417 = vmatmul.mubr.f32.vlgmr.msra.gmra.mrb[18].mxu0 %v2235_v62 }
 0x598   : > { %3826 = vmatpush3.bf16.msra.mxu0 %v3825_v37  ;;  %3365 = vmatprep.mubr.msk.f32.mxu0 %vm4042_vm12, %v4039_v7  ;;  %v3870_v37 = vpack.c.bf16 %v3253_v36, %v3252_v35 }
 0x599   : > { %3827 = vmatprep.subr.bf16.mxu0 %v4041_v51 }
 0x59c   : > { %3829 = vmatpush3.bf16.msra.mxu0 %v3828_v41 }
 0x59d   : > { %3830 = vmatprep.subr.bf16.mxu0 %v4041_v51 }
 0x5a0   : > { %3832 = vmatpush3.bf16.msra.mxu0 %v3831_v47 }
 0x5a1   : > { %3833 = vmatprep.subr.bf16.mxu0 %v4041_v51 }
 0x5a4   : > { %3835 = vmatpush3.bf16.msra.mxu0 %v3834_v54 }
 0x5a5   : > { %3836 = vmatprep.subr.bf16.mxu0 %v4041_v51 }
 0x5a8   : > { %3838 = vmatpush3.bf16.msra.mxu0 %v3837_v60 }
 0x5a9   : > { %3854 = vmatprep.subr.bf16.mxu0 %v4041_v51 }
 0x642   : > { %v2327_v61 = vpop.f32.mrb[16].mxu0 }
 0x643   : > { %v2329_v62 = vpop.f32.mrb[17].mxu0 }
 0x66a   : > { %v2418_v63 = vpop.f32.mrb[18].mxu0 }
 0x66b   : > { %v2422_v0 = vmax.f32 %v2327_v61, %v2418_v63  ;;  %v2420_v1 = vpop.f32.mrb[19].mxu0 }
 0x66d   : > { %2424 = vst.msk [vmem:[#allocation3] sm:$0x1f] %vm2423_vm13, %v2422_v0 }
 0x674   : > { %v2436_v15 = vld [vmem:[#allocation3 + $0x1] sm:$0x1]  ;;  %v2425_v17 = vld [vmem:[#allocation3] sm:$0x1]  ;;  %v2595_v40 = vld [vmem:[#allocation3 + $0x2] sm:$0x1] }
 0x675   : > { %3343 = vmatmul.mubr.msk.f32.vlgmr.msra.gmra.mrb[16].mxu1 %vm2448_vm14, %v2436_v15  ;;  %3366 = vmatmul.mubr.msk.f32.vlgmr.msra.gmra.mrb[20].mxu0 %vm2448_vm14, %v2425_v17  ;;  %v2681_v41 = vld [vmem:[#allocation3 + $0x3] sm:$0x1]  ;;  %v2767_v52 = vld [vmem:[#allocation3 + $0x4] sm:$0x1] }
 0x676   : > { %3841 = vmatpush3.bf16.msra.mxu1 %v3840_v6  ;;  %3856 = vmatpush3.bf16.msra.mxu0 %v3855_v8 }
 0x677   : > { %3842 = vmatprep.subr.bf16.mxu1 %v4041_v51  ;;  %3857 = vmatprep.subr.bf16.mxu0 %v4041_v51 }
 0x678   : > { %3388 = vmatprep.mubr.msk.f32.mxu1 %vm4042_vm12, %v4039_v7  ;;  %3411 = vmatprep.mubr.msk.f32.mxu0 %vm4042_vm12, %v4039_v7 }
 0x67a   : > { %3844 = vmatpush3.bf16.msra.mxu1 %v3843_v18  ;;  %3859 = vmatpush3.bf16.msra.mxu0 %v3858_v19 }
 0x67b   : > { %3845 = vmatprep.subr.bf16.mxu1 %v4041_v51  ;;  %3860 = vmatprep.subr.bf16.mxu0 %v4041_v51 }
 0x67e   : > { %3847 = vmatpush3.bf16.msra.mxu1 %v3846_v24  ;;  %3862 = vmatpush3.bf16.msra.mxu0 %v3861_v25 }
 0x67f   : > { %3848 = vmatprep.subr.bf16.mxu1 %v4041_v51  ;;  %3863 = vmatprep.subr.bf16.mxu0 %v4041_v51 }
 0x682   : > { %3850 = vmatpush3.bf16.msra.mxu1 %v3849_v27  ;;  %3865 = vmatpush3.bf16.msra.mxu0 %v3864_v28 }
 0x683   : > { %3851 = vmatprep.subr.bf16.mxu1 %v4041_v51  ;;  %3866 = vmatprep.subr.bf16.mxu0 %v4041_v51 }
 0x686   : > { %3853 = vmatpush3.bf16.msra.mxu1 %v3852_v33  ;;  %3868 = vmatpush3.bf16.msra.mxu0 %v3867_v34 }
 0x687   : > { %3869 = vmatprep.subr.bf16.mxu1 %v4041_v51 }
 0x689   : > { %3389 = vmatmul.mubr.msk.f32.vlgmr.msra.gmra.mrb[18].mxu1 %vm2448_vm14, %v2595_v40  ;;  %3412 = vmatmul.mubr.msk.f32.vlgmr.msra.gmra.mrb[22].mxu0 %vm2448_vm14, %v2681_v41 }
 0x68a   : > { %3871 = vmatpush3.bf16.msra.mxu1 %v3870_v37  ;;  %3434 = vmatprep.mubr.msk.f32.mxu1 %vm4042_vm12, %v4039_v7  ;;  %v3259_v7 = vld [vmem:[%s5534_s9 + $0x178] sm:$0xff] }
 0x68b   : > { %3872 = vmatprep.subr.bf16.mxu1 %v4041_v51  ;;  %v3879_v47 = vpack.c.bf16 %v3259_v7, %v3258_v46 }
 0x68e   : > { %3874 = vmatpush3.bf16.msra.mxu1 %v3873_v42 }
 0x68f   : > { %3875 = vmatprep.subr.bf16.mxu1 %v4041_v51 }
 0x692   : > { %3877 = vmatpush3.bf16.msra.mxu1 %v3876_v45 }
 0x693   : > { %3878 = vmatprep.subr.bf16.mxu1 %v4041_v51 }
 0x696   : > { %3880 = vmatpush3.bf16.msra.mxu1 %v3879_v47 }
 0x697   : > { %3881 = vmatprep.subr.bf16.mxu1 %v4041_v51  ;;  %v2853_v51 = vld [vmem:[%s5535_s10] sm:$0x1] }
 0x69a   : > { %3883 = vmatpush3.bf16.msra.mxu1 %v3882_v50 }
 0x69d   : > { %3435 = vmatmul.mubr.msk.f32.vlgmr.msra.gmra.mrb[20].mxu1 %vm2448_vm14, %v2767_v52 }
 0x748   : > { %v2518_v53 = vpop.f32.mrb[16].mxu1  ;;  %v2591_v54 = vpop.f32.mrb[20].mxu0 }
 0x749   : > { %v2592_v55 = vadd.f32 %v2591_v54, %v2518_v53  ;;  %v3344_v56 = vpop.f32.mrb[17].mxu1  ;;  %v3367_v57 = vpop.f32.mrb[21].mxu0 }
 0x75c   : > { %v2676_v58 = vpop.f32.mrb[18].mxu1  ;;  %v2762_v59 = vpop.f32.mrb[22].mxu0 }
 0x75d   : > { %v2680_v60 = vadd.f32 %v2676_v58, %v2592_v55  ;;  %v3390_v61 = vpop.f32.mrb[19].mxu1  ;;  %v3413_v62 = vpop.f32.mrb[23].mxu0 }
 0x75f   : > { %v2766_v63 = vadd.f32 %v2762_v59, %v2680_v60 }
 0x770   : > { %v2848_v0 = vpop.f32.mrb[20].mxu1 }
 0x771   : > { %v2852_v1 = vadd.f32 %v2848_v0, %v2766_v63  ;;  %v3436_v2 = vpop.f32.mrb[21].mxu1 }
 0x773   : > { %v2854_v3 = vadd.f32 %v2853_v51, %v2852_v1 }
 0x775   : > { %2855 = vst [vmem:[%s378_s14] sm:$0x1] %v2854_v3 }
 0x776   : > { %3988 = shalt.err (!%p3985_p3)
}
 0x777   : > { %s3989_s24 = scalar_lea.hbm %s5483_s16, 16  ;;  %s3993_s14 = scalar_lea.hbm %s5536_s11, 32 }
 0x778   : > { %p3990_p4 = scmp.ne.s32.totalorder %s5483_s16, %s3989_s24  ;;  %p3994_p9 = scmp.lt.u32.totalorder %s5483_s16, %s5536_s11 }
 0x779   : > { %p3995_p10 = scmp.lt.u32.totalorder %s3993_s14, %s3989_s24  ;;  %p3997_p12 = scmp.lt.u32.totalorder %s3989_s24, %s5483_s16 }
 0x77a   : > { %p3991_p7 = pnand %p3990_p4, %p4142_p5 }
 0x77b   : > { %p3996_p11 = por %p3995_p10, %p3994_p9 }
 0x77c   : > { %p3992_p8 = pneg %p3991_p7 }
 0x77d   : > { %p3998_p13 = por %p3997_p12, %p3996_p11 }
 0x77f   : > { %p3999_p0 = pnand %p3998_p13, %p3992_p8 }
 0x781   : > { %4002 = shalt.err (!%p3999_p0)
}
 0x782   : > { %3932 = dma.vmem_to_hbm [thread:$0]  (%p4142_p5), %s5485_s15, 16, %s5483_s16, %s2857_s26  }
 0x783 PF: > { %p3938_p1 = scmp.ge.s32.totalorder %s4037_s20, 2  ;;  %s2881_s29 = sand.u32 1, %s4025_s17  }
 0x784   : > { %s2882_s21 = scalar_lea.sflag [#allocation5], %s2881_s29 }
 0x785   : > { %p3935_p2 = pnand %p3938_p1, %p4146_p6 }
 0x787   : > { %4020 = dma.done.wait (!%p3935_p2), %s2882_s21, 16  }
 0x788   : > { %4022 = vsyncadd (!%p3935_p2), %s2882_s21, 4294967280  ;;  %s5542_s22 = sld [smem:[#allocation7_spill]]  ;;  %s5543_s19 = sld [smem:[#allocation8_spill]] }
 0x789   : > { %p21_p3 = scmp.ge.s32.totalorder %s4129_s23, 4   ;;  %s5544_s17 = smov %s4029_s18 }
 0x78a   : > { %s5546_s20 = smov %s4129_s23 }
 0x78b   :  { %23 = sbr.rel (!%p21_p3) target bundleno = 3 (0x3), region = 115 }
 0x78e   : > { %s5545_s18 = smov %s5542_s22 }
 0x792   :  { %2886 = vsyncpa [#allocation5], 1 }
 0x793   :  { %2888 = vsyncpa [#allocation5 + $0x1], 1 }

</bundles_post_ra>
